<compile_context>
chip_gen: v7x
topology: tpu7x:2x2x1
jax: 0.10.0
libtpu: 0.0.40
codegen_flags: <defaults>
</compile_context>

<pallas_src>
import functools
import math

import jax
import jax.numpy as jnp
from jax.experimental import pallas as pl
from jax.experimental.pallas import tpu as pltpu

# Explicit scoped-VMEM budget: <= ~48 MiB keeps v7x (64 MiB/TC) happy while still being a big
# raise over the 16/32 MiB defaults on v5e/v6e.  Working sets here are << 1 MiB anyway.
VMEM_LIMIT_BYTES = 48 * 1024 * 1024


def _round_up(x, m):
    return (x + m - 1) // m * m


def _row_tile(rows, max_tile=512):
    """Row tile: multiple of 8 (or the full extent) aiming for >=2 grid steps (megacore)."""
    if rows < 16:
        return rows
    return int(min(max_tile, _round_up(pl.cdiv(rows, 2), 8)))


def _rope_perm(n_heads, head_dim):
    """Column permutation turning interleaved (r0,i0,r1,i1,...) RoPE pairs into the
    rotate-half layout (r0..r_{d/2-1}, i0..i_{d/2-1}) per head.  Folded into Wq/Wk."""
    idx = []
    for h in range(n_heads):
        base = h * head_dim
        idx += [base + 2 * i for i in range(head_dim // 2)]
        idx += [base + 2 * i + 1 for i in range(head_dim // 2)]
    return jnp.asarray(idx, dtype=jnp.int32)


# ----------------------------------------------------------------------------
# Fused transformer attention block (per batch element)
# ----------------------------------------------------------------------------
def _attn_block_kernel(x_ref, nw_ref, wqkv_ref, wo_ref, cos_ref, sin_ref, bias_ref,
                       o_ref, *, n_heads, eps):
    S, E = x_ref.shape
    D = E // n_heads
    half = D // 2
    scale = 1.0 / math.sqrt(D)

    x = x_ref[...].astype(jnp.float32)                                   # (S, E)
    nw = nw_ref[...].astype(jnp.float32)                                 # (1, E)
    hn = x * jax.lax.rsqrt(jnp.mean(x * x, axis=-1, keepdims=True) + eps) * nw

    # fused Q|K|V projection (one MXU pass over hn)
    qkv = jnp.dot(hn, wqkv_ref[...], preferred_element_type=jnp.float32)  # (S, 3E)

    cos = cos_ref[...]                                                    # (S, D)
    sin = sin_ref[...]
    bias = bias_ref[...]                                                  # (1, S): 0 / -1e30

    def rope(t):  # rotate-half RoPE (Wq/Wk columns were pre-permuted accordingly)
        rot = jnp.concatenate([-t[:, half:], t[:, :half]], axis=-1)
        return t * cos + rot * sin

    # TODO(synk): for long sequences flash-tile the key axis (online softmax) instead of
    # materializing the full (S, S) score matrix per head.
    head_outs = []
    for h in range(n_heads):                                              # static unroll
        q = rope(qkv[:, h * D:(h + 1) * D])
        k = rope(qkv[:, E + h * D:E + (h + 1) * D])
        v = qkv[:, 2 * E + h * D:2 * E + (h + 1) * D]
        s = jax.lax.dot_general(q, k, (((1,), (1,)), ((), ())),
                                preferred_element_type=jnp.float32) * scale + bias
        s = s - jnp.max(s, axis=-1, keepdims=True)
        p = jnp.exp(s)
        p = p / jnp.sum(p, axis=-1, keepdims=True)
        head_outs.append(jnp.dot(p, v, preferred_element_type=jnp.float32))
    attn = jnp.concatenate(head_outs, axis=-1)                            # (S, E) lane-dense

    out = x + jnp.dot(attn, wo_ref[...], preferred_element_type=jnp.float32)  # residual
    o_ref[...] = out.astype(o_ref.dtype)


def attention_block(x, norm_w, wqkv, wo, cos_h, sin_h, key_bias, *, n_heads, eps):
    B, S, E = x.shape
    D = E // n_heads
    return pl.pallas_call(
        functools.partial(_attn_block_kernel, n_heads=n_heads, eps=eps),
        out_shape=jax.ShapeDtypeStruct((B, S, E), x.dtype),
        grid_spec=pltpu.PrefetchScalarGridSpec(
            num_scalar_prefetch=0,
            grid=(B,),
            in_specs=[
                pl.BlockSpec((None, S, E), lambda b: (b, 0, 0)),
                pl.BlockSpec((1, E), lambda b: (0, 0)),          # norm weight (resident)
                pl.BlockSpec((E, 3 * E), lambda b: (0, 0)),      # fused Wq|Wk|Wv (resident)
                pl.BlockSpec((E, E), lambda b: (0, 0)),          # Wo (resident)
                pl.BlockSpec((S, D), lambda b: (0, 0)),          # cos (resident)
                pl.BlockSpec((S, D), lambda b: (0, 0)),          # sin (resident)
                pl.BlockSpec((None, 1, S), lambda b: (b, 0, 0)),  # key-padding bias
            ],
            out_specs=pl.BlockSpec((None, S, E), lambda b: (b, 0, 0)),
        ),
        compiler_params=pltpu.CompilerParams(
            dimension_semantics=("parallel",),
            vmem_limit_bytes=VMEM_LIMIT_BYTES,
        ),
    )(x, norm_w.reshape(1, E), wqkv, wo, cos_h, sin_h, key_bias)


# ----------------------------------------------------------------------------
# Fused feed-forward block (row-tiled over B*S)
# ----------------------------------------------------------------------------
def _ffn_block_kernel(x_ref, nw_ref, w13_ref, w2_ref, o_ref, *, eps, hidden):
    x = x_ref[...].astype(jnp.float32)
    nw = nw_ref[...].astype(jnp.float32)
    hn = x * jax.lax.rsqrt(jnp.mean(x * x, axis=-1, keepdims=True) + eps) * nw
    u = jnp.dot(hn, w13_ref[...], preferred_element_type=jnp.float32)    # (tm, 2*hidden)
    a = u[:, :hidden]
    b = u[:, hidden:]
    g = a * jax.nn.sigmoid(a) * b                                        # silu(w1 x) * (w3 x)
    out = x + jnp.dot(g, w2_ref[...], preferred_element_type=jnp.float32)  # residual
    o_ref[...] = out.astype(o_ref.dtype)


def ffn_block(x, norm_w, w13, w2, *, eps, hidden):
    B, S, E = x.shape
    rows = B * S
    x2 = x.reshape(rows, E)
    tm = _row_tile(rows)
    grid = (pl.cdiv(rows, tm),)
    # TODO(synk): weights are kept fully resident; for very large dim/hidden tile the N/K axes.
    out = pl.pallas_call(
        functools.partial(_ffn_block_kernel, eps=eps, hidden=hidden),
        out_shape=jax.ShapeDtypeStruct((rows, E), x.dtype),
        grid_spec=pltpu.PrefetchScalarGridSpec(
            num_scalar_prefetch=0,
            grid=grid,
            in_specs=[
                pl.BlockSpec((tm, E), lambda i: (i, 0)),
                pl.BlockSpec((1, E), lambda i: (0, 0)),
                pl.BlockSpec((E, 2 * hidden), lambda i: (0, 0)),  # fused W1|W3 (resident)
                pl.BlockSpec((hidden, E), lambda i: (0, 0)),      # W2 (resident)
            ],
            out_specs=pl.BlockSpec((tm, E), lambda i: (i, 0)),
        ),
        compiler_params=pltpu.CompilerParams(
            dimension_semantics=("parallel",),
            vmem_limit_bytes=VMEM_LIMIT_BYTES,
        ),
    )(x2, norm_w.reshape(1, E), w13, w2)
    return out.reshape(B, S, E)


# ----------------------------------------------------------------------------
# Fused final norms + AttentionAgg2 (per batch element)
# ----------------------------------------------------------------------------
def _att_agg_kernel(x_ref, n1_ref, n2_ref, wqkv_ref, bias_ref, mask_ref, wl_ref,
                    o_ref, *, eps):
    S, E = x_ref.shape
    x = x_ref[...].astype(jnp.float32)

    def rms(t, w):
        return t * jax.lax.rsqrt(jnp.mean(t * t, axis=-1, keepdims=True) + eps) * w

    h = rms(rms(x, n1_ref[...]), n2_ref[...])                            # norm then norm2

    qkv = jnp.dot(h, wqkv_ref[...], preferred_element_type=jnp.float32)  # (S, 3E)
    q = qkv[:, :E]
    k = qkv[:, E:2 * E]
    v = qkv[:, 2 * E:]

    m = mask_ref[...]                                                    # (1, S), 1.0 = valid
    wei = jax.lax.dot_general(q, k, (((1,), (1,)), ((), ())),
                              preferred_element_type=jnp.float32)        # (S, S)
    wei = wei + bias_ref[...]                                            # positional bias
    wei = jnp.where(m > 0.5, wei, -1e9)                                  # masked_fill(==0,-1e9)
    wei = wei - jnp.max(wei, axis=-1, keepdims=True)
    wei = jnp.exp(wei)
    wei = wei / jnp.sum(wei, axis=-1, keepdims=True)
    out = jnp.dot(wei, v, preferred_element_type=jnp.float32)            # (S, E)

    # attention pooling: the nn.Linear(emb,1) bias shifts every logit equally and cancels
    # inside the softmax, so only the weight row is used here.
    logits = jax.lax.dot_general(wl_ref[...], out, (((1,), (1,)), ((), ())),
                                 preferred_element_type=jnp.float32)     # (1, S)
    logits = jnp.where(m > 0.5, logits, -1e9)
    aw = jnp.exp(logits - jnp.max(logits, axis=-1, keepdims=True))
    aw = aw / jnp.sum(aw, axis=-1, keepdims=True)
    pooled = jnp.dot(aw, out, preferred_element_type=jnp.float32)        # (1, E)
    o_ref[...] = pooled.astype(o_ref.dtype)


def att_agg(x, norm_w, norm2_w, wqkv, bias2d, mask_f, wl, *, eps):
    B, S, E = x.shape
    out = pl.pallas_call(
        functools.partial(_att_agg_kernel, eps=eps),
        out_shape=jax.ShapeDtypeStruct((B, 1, E), jnp.float32),
        grid_spec=pltpu.PrefetchScalarGridSpec(
            num_scalar_prefetch=0,
            grid=(B,),
            in_specs=[
                pl.BlockSpec((None, S, E), lambda b: (b, 0, 0)),
                pl.BlockSpec((1, E), lambda b: (0, 0)),
                pl.BlockSpec((1, E), lambda b: (0, 0)),
                pl.BlockSpec((E, 3 * E), lambda b: (0, 0)),       # fused agg Wq|Wk|Wv
                pl.BlockSpec((S, S), lambda b: (0, 0)),           # positional bias (resident)
                pl.BlockSpec((None, 1, S), lambda b: (b, 0, 0)),  # padding mask
                pl.BlockSpec((1, E), lambda b: (0, 0)),           # pooling weight
            ],
            out_specs=pl.BlockSpec((None, 1, E), lambda b: (b, 0, 0)),
        ),
        compiler_params=pltpu.CompilerParams(
            dimension_semantics=("parallel",),
            vmem_limit_bytes=VMEM_LIMIT_BYTES,
        ),
    )(x, norm_w.reshape(1, E), norm2_w.reshape(1, E), wqkv, bias2d, mask_f, wl)
    return out.reshape(B, E)


# ----------------------------------------------------------------------------
# Wrapper-side precomputes (data independent)
# ----------------------------------------------------------------------------
def precompute_freqs(head_dim, seqlen, theta=10000.0):
    inv = 1.0 / (theta ** (jnp.arange(0, head_dim, 2, dtype=jnp.float32)[: head_dim // 2]
                           / head_dim))
    t = jnp.arange(seqlen, dtype=jnp.float32)
    freqs = jnp.outer(t, inv)
    return jnp.cos(freqs), jnp.sin(freqs)


def apply_rope(xq, xk, cos, sin):
    """Interleaved (even/odd pair) rotary embedding — reference path only."""
    def rot(x):
        xf = x.astype(jnp.float32).reshape(x.shape[:-1] + (-1, 2))
        xr, xi = xf[..., 0], xf[..., 1]
        c = cos[None, :, None, :]
        s = sin[None, :, None, :]
        out = jnp.stack([xr * c - xi * s, xr * s + xi * c], axis=-1)
        return out.reshape(x.shape).astype(x.dtype)
    return rot(xq), rot(xk)


def _agg_bias(seqlen, wm, bm, eps=1e-7):
    """1 / log(relu(w_m(|i - j| + eps)) + 2*eps) — data-independent precompute.
    Note: inherits the reference's 1/log singularity near relu(.)+2eps == 1."""
    rng = jnp.arange(seqlen, dtype=jnp.float32)
    delta = jnp.abs(rng[:, None] - rng[None, :]) + eps
    dd = jnp.maximum(
        jnp.dot(delta, wm, precision=jax.lax.Precision.HIGHEST) + bm[None, :], 0.0)
    return 1.0 / jnp.log(dd + eps + eps)


# ----------------------------------------------------------------------------
# Full module forward (Pallas path)
# ----------------------------------------------------------------------------
def forward_pallas(params, x, lengths, cfg):
    B, S, E = x.shape
    H = cfg["n_heads"]
    D = E // H
    eps = cfg["norm_eps"]
    hidden = cfg["hidden_dim"]

    cos, sin = precompute_freqs(D, S)                                      # (S, D//2)
    cos_h = jnp.concatenate([cos, cos], axis=-1)                           # rotate-half tables
    sin_h = jnp.concatenate([sin, sin], axis=-1)
    perm = _rope_perm(H, D)

    valid = jnp.arange(S)[None, :] < lengths[:, None]                      # (B, S)
    key_bias = jnp.where(valid, 0.0, -1e30).astype(jnp.float32)[:, None, :]  # (B,1,S)
    mask_f = valid.astype(jnp.float32)[:, None, :]                         # (B,1,S)

    h = x  # nn.Dropout layers are inference-mode identities.
    for layer in params["layers"]:
        # Fuse Q|K|V weights (with the RoPE column permutation folded into Wq/Wk) —
        # in production these concats would be done once, offline.
        wqkv = jnp.concatenate(
            [layer["wq"][:, perm], layer["wk"][:, perm], layer["wv"]], axis=1)
        h = attention_block(h, layer["attn_norm_w"], wqkv, layer["wo"],
                            cos_h, sin_h, key_bias, n_heads=H, eps=eps)
        w13 = jnp.concatenate([layer["w1"], layer["w3"]], axis=1)
        h = ffn_block(h, layer["ffn_norm_w"], w13, layer["w2"], eps=eps, hidden=hidden)

    agg = params["agg"]
    bias2d = _agg_bias(S, agg["wm"], agg["bm"])
    wqkv_agg = jnp.concatenate([agg["wq"], agg["wk"], agg["wv"]], axis=1)
    return att_agg(h, params["norm_w"], params["norm2_w"], wqkv_agg, bias2d,
                   mask_f, agg["wl"], eps=eps)


# ----------------------------------------------------------------------------
# Pure-JAX reference (for correctness check)
# ----------------------------------------------------------------------------
def _rmsnorm_ref(x, w, eps):
    xf = x.astype(jnp.float32)
    y = xf * jax.lax.rsqrt(jnp.mean(xf * xf, axis=-1, keepdims=True) + eps)
    return y.astype(x.dtype) * w


def forward_ref(params, x, lengths, cfg):
    P = jax.lax.Precision.HIGHEST
    B, S, E = x.shape
    H = cfg["n_heads"]
    D = E // H
    eps = cfg["norm_eps"]
    cos, sin = precompute_freqs(D, S)
    valid = jnp.arange(S)[None, :] < lengths[:, None]

    h = x
    for layer in params["layers"]:
        hn = _rmsnorm_ref(h, layer["attn_norm_w"], eps)
        q = jnp.einsum("bse,eo->bso", hn, layer["wq"], precision=P).reshape(B, S, H, D)
        k = jnp.einsum("bse,eo->bso", hn, layer["wk"], precision=P).reshape(B, S, H, D)
        v = jnp.einsum("bse,eo->bso", hn, layer["wv"], precision=P).reshape(B, S, H, D)
        q, k = apply_rope(q, k, cos, sin)
        qt, kt, vt = (t.transpose(0, 2, 1, 3) for t in (q, k, v))
        s = jnp.einsum("bhqd,bhkd->bhqk", qt, kt, precision=P) / math.sqrt(D)
        s = jnp.where(valid[:, None, None, :], s, -1e30)
        attn = jnp.einsum("bhqk,bhkd->bhqd", jax.nn.softmax(s, axis=-1), vt, precision=P)
        attn = attn.transpose(0, 2, 1, 3).reshape(B, S, E)
        h = h + jnp.einsum("bse,eo->bso", attn, layer["wo"], precision=P)

        hn = _rmsnorm_ref(h, layer["ffn_norm_w"], eps)
        a = jnp.einsum("bse,eh->bsh", hn, layer["w1"], precision=P)
        g = jax.nn.silu(a) * jnp.einsum("bse,eh->bsh", hn, layer["w3"], precision=P)
        h = h + jnp.einsum("bsh,he->bse", g, layer["w2"], precision=P)

    h = _rmsnorm_ref(h, params["norm_w"], eps)
    h = _rmsnorm_ref(h, params["norm2_w"], eps)

    agg = params["agg"]
    bias2d = _agg_bias(S, agg["wm"], agg["bm"])
    q = jnp.einsum("bse,eo->bso", h, agg["wq"], precision=P)
    k = jnp.einsum("bse,eo->bso", h, agg["wk"], precision=P)
    v = jnp.einsum("bse,eo->bso", h, agg["wv"], precision=P)
    wei = jnp.einsum("bqe,bke->bqk", q, k, precision=P) + bias2d[None]
    wei = jnp.where(valid[:, None, :], wei, -1e9)
    out = jnp.einsum("bqk,bke->bqe", jax.nn.softmax(wei, axis=-1), v, precision=P)
    logits = jnp.einsum("bse,oe->bso", out, agg["wl"], precision=P)[..., 0] + agg["bl"][0, 0]
    logits = jnp.where(valid, logits, -1e9)
    aw = jax.nn.softmax(logits, axis=-1)[..., None]
    return jnp.sum(out * aw, axis=1)


# ----------------------------------------------------------------------------
# Deterministic parameter construction (weights stored as (fan_in, fan_out))
# ----------------------------------------------------------------------------
def init_params(key, cfg, seqlen):
    dim, hidden = cfg["dim"], cfg["hidden_dim"]
    keys = iter(jax.random.split(key, 64))

    def lin(fan_in, fan_out, std=0.02):
        return std * jax.random.normal(next(keys), (fan_in, fan_out), dtype=jnp.float32)

    def norm_w():
        return (jnp.ones((dim,), jnp.float32)
                + 0.01 * jax.random.normal(next(keys), (dim,), dtype=jnp.float32))

    layers = []
    for _ in range(cfg["n_layers"]):
        layers.append(dict(
            attn_norm_w=norm_w(), ffn_norm_w=norm_w(),
            wq=lin(dim, dim), wk=lin(dim, dim), wv=lin(dim, dim), wo=lin(dim, dim),
            w1=lin(dim, hidden), w2=lin(hidden, dim), w3=lin(dim, hidden),
        ))
    agg = dict(
        wq=lin(dim, dim), wk=lin(dim, dim), wv=lin(dim, dim),
        # small w_m init keeps relu(w_m(delta)) away from the 1/log singularity at 1.0
        wm=0.005 * jax.random.normal(next(keys), (seqlen, seqlen), dtype=jnp.float32),
        bm=jnp.zeros((seqlen,), jnp.float32),
        wl=0.02 * jax.random.normal(next(keys), (1, dim), dtype=jnp.float32),
        bl=jnp.zeros((1, 1), jnp.float32),   # nn.Linear biases are zero-initialized
    )
    return dict(layers=layers, norm_w=norm_w(), norm2_w=norm_w(), agg=agg)


if __name__ == "__main__":
    cfg = dict(dim=128, n_layers=2, n_heads=4, hidden_dim=256, norm_eps=1e-5)
    batch, seqlen = 2, 16

    key = jax.random.PRNGKey(0)
    k_params, k_x = jax.random.split(key)
    params = init_params(k_params, cfg, seqlen)
    x = jax.random.normal(k_x, (batch, seqlen, cfg["dim"]), dtype=jnp.float32)
    lengths = jnp.array([seqlen, seqlen - 5], dtype=jnp.int32)

    fwd = jax.jit(lambda p, xx, ll: forward_pallas(p, xx, ll, cfg))
    out = jax.block_until_ready(fwd(params, x, lengths))

    ref = forward_ref(params, x, lengths, cfg)
    assert out.shape == (batch, cfg["dim"]) and out.dtype == jnp.float32
    assert bool(jnp.all(jnp.isfinite(out)))
    err = float(jnp.max(jnp.abs(out - ref)))
    assert jnp.allclose(out, ref, atol=2e-3, rtol=2e-3), f"mismatch vs reference: {err}"

    print("KERNEL_OK")
</pallas_src>

<mosaic_0001>
module attributes {stable_mosaic.version = 11 : i64} {
  func.func @_attn_block_kernel(%arg0: i32, %arg1: memref<1x16x128xf32, #tpu.memory_space<vmem>>, %arg2: memref<1x128xf32, #tpu.memory_space<vmem>>, %arg3: memref<128x384xf32, #tpu.memory_space<vmem>>, %arg4: memref<128x128xf32, #tpu.memory_space<vmem>>, %arg5: memref<16x32xf32, #tpu.memory_space<vmem>>, %arg6: memref<16x32xf32, #tpu.memory_space<vmem>>, %arg7: memref<1x1x16xf32, #tpu.memory_space<vmem>>, %arg8: memref<1x16x128xf32, #tpu.memory_space<vmem>>) attributes {dimension_semantics = [#tpu.dimension_semantics<parallel>], iteration_bounds = array<i64: 2>, scalar_prefetch = 0 : i64, scratch_operands = 0 : i64, tpu.core_type = #tpu.core_type<tc>, window_params = [{transform_indices = @transform_0, window_bounds = array<i64: 1, 16, 128>}, {pipeline_mode = #tpu.pipeline_mode<synchronous>, transform_indices = @transform_1, window_bounds = array<i64: 1, 128>}, {pipeline_mode = #tpu.pipeline_mode<synchronous>, transform_indices = @transform_2, window_bounds = array<i64: 128, 384>}, {pipeline_mode = #tpu.pipeline_mode<synchronous>, transform_indices = @transform_3, window_bounds = array<i64: 128, 128>}, {pipeline_mode = #tpu.pipeline_mode<synchronous>, transform_indices = @transform_4, window_bounds = array<i64: 16, 32>}, {pipeline_mode = #tpu.pipeline_mode<synchronous>, transform_indices = @transform_5, window_bounds = array<i64: 16, 32>}, {transform_indices = @transform_6, window_bounds = array<i64: 1, 1, 16>}, {transform_indices = @transform_7, window_bounds = array<i64: 1, 16, 128>}]} {
    %c0 = arith.constant 0 : index
    %c0_0 = arith.constant 0 : index
    %c0_1 = arith.constant 0 : index
    %0 = vector.load %arg1[%c0, %c0_0, %c0_1] : memref<1x16x128xf32, #tpu.memory_space<vmem>>, vector<1x16x128xf32>
    %1 = vector.shape_cast %0 : vector<1x16x128xf32> to vector<16x128xf32>
    %c0_2 = arith.constant 0 : index
    %c0_3 = arith.constant 0 : index
    %2 = vector.load %arg2[%c0_2, %c0_3] : memref<1x128xf32, #tpu.memory_space<vmem>>, vector<1x128xf32>
    %3 = arith.mulf %1, %1 : vector<16x128xf32>
    %cst = arith.constant dense<0.000000e+00> : vector<16xf32>
    %4 = vector.multi_reduction <add>, %3, %cst [1] : vector<16x128xf32> to vector<16xf32>
    %5 = vector.shape_cast %4 : vector<16xf32> to vector<16x1xf32>
    %cst_4 = arith.constant 1.280000e+02 : f32
    %6 = vector.broadcast %cst_4 : f32 to vector<16x1xf32>
    %7 = arith.divf %5, %6 : vector<16x1xf32>
    %cst_5 = arith.constant 9.99999974E-6 : f32
    %8 = vector.broadcast %cst_5 : f32 to vector<16x1xf32>
    %9 = arith.addf %7, %8 : vector<16x1xf32>
    %10 = math.rsqrt %9 : vector<16x1xf32>
    %11 = vector.broadcast %10 : vector<16x1xf32> to vector<16x128xf32>
    %12 = arith.mulf %1, %11 : vector<16x128xf32>
    %13 = vector.broadcast %2 : vector<1x128xf32> to vector<16x128xf32>
    %14 = arith.mulf %12, %13 : vector<16x128xf32>
    %c0_6 = arith.constant 0 : index
    %c0_7 = arith.constant 0 : index
    %15 = vector.load %arg3[%c0_6, %c0_7] : memref<128x384xf32, #tpu.memory_space<vmem>>, vector<128x384xf32>
    %cst_8 = arith.constant dense<0.000000e+00> : vector<16x384xf32>
    %16 = tpu.matmul %14, %15, %cst_8 {dimension_numbers = #tpu.dot_dimension_numbers<[1], [0], [0], [1], [0, 0, 1, 1], [], []>} : vector<16x128xf32>, vector<128x384xf32>, vector<16x384xf32> -> vector<16x384xf32>
    %c0_9 = arith.constant 0 : index
    %c0_10 = arith.constant 0 : index
    %17 = vector.load %arg5[%c0_9, %c0_10] : memref<16x32xf32, #tpu.memory_space<vmem>>, vector<16x32xf32>
    %c0_11 = arith.constant 0 : index
    %c0_12 = arith.constant 0 : index
    %18 = vector.load %arg6[%c0_11, %c0_12] : memref<16x32xf32, #tpu.memory_space<vmem>>, vector<16x32xf32>
    %c0_13 = arith.constant 0 : index
    %c0_14 = arith.constant 0 : index
    %c0_15 = arith.constant 0 : index
    %19 = vector.load %arg7[%c0_13, %c0_14, %c0_15] : memref<1x1x16xf32, #tpu.memory_space<vmem>>, vector<1x1x16xf32>
    %20 = vector.shape_cast %19 : vector<1x1x16xf32> to vector<1x16xf32>
    %21 = vector.extract_strided_slice %16 {offsets = [0, 0], sizes = [16, 32], strides = [1, 1]} : vector<16x384xf32> to vector<16x32xf32>
    %22 = vector.extract_strided_slice %21 {offsets = [0, 16], sizes = [16, 16], strides = [1, 1]} : vector<16x32xf32> to vector<16x16xf32>
    %cst_16 = arith.constant 0.000000e+00 : f32
    %23 = vector.broadcast %cst_16 : f32 to vector<16x16xf32>
    %24 = arith.subf %23, %22 : vector<16x16xf32>
    %25 = vector.extract_strided_slice %21 {offsets = [0, 0], sizes = [16, 16], strides = [1, 1]} : vector<16x32xf32> to vector<16x16xf32>
    %26 = tpu.concatenate %24, %25 in 1 : vector<16x16xf32>, vector<16x16xf32> -> vector<16x32xf32>
    %27 = arith.mulf %21, %17 : vector<16x32xf32>
    %28 = arith.mulf %26, %18 : vector<16x32xf32>
    %29 = arith.addf %27, %28 : vector<16x32xf32>
    %30 = vector.extract_strided_slice %16 {offsets = [0, 128], sizes = [16, 32], strides = [1, 1]} : vector<16x384xf32> to vector<16x32xf32>
    %31 = vector.extract_strided_slice %30 {offsets = [0, 16], sizes = [16, 16], strides = [1, 1]} : vector<16x32xf32> to vector<16x16xf32>
    %cst_17 = arith.constant 0.000000e+00 : f32
    %32 = vector.broadcast %cst_17 : f32 to vector<16x16xf32>
    %33 = arith.subf %32, %31 : vector<16x16xf32>
    %34 = vector.extract_strided_slice %30 {offsets = [0, 0], sizes = [16, 16], strides = [1, 1]} : vector<16x32xf32> to vector<16x16xf32>
    %35 = tpu.concatenate %33, %34 in 1 : vector<16x16xf32>, vector<16x16xf32> -> vector<16x32xf32>
    %36 = arith.mulf %30, %17 : vector<16x32xf32>
    %37 = arith.mulf %35, %18 : vector<16x32xf32>
    %38 = arith.addf %36, %37 : vector<16x32xf32>
    %39 = vector.extract_strided_slice %16 {offsets = [0, 256], sizes = [16, 32], strides = [1, 1]} : vector<16x384xf32> to vector<16x32xf32>
    %cst_18 = arith.constant dense<0.000000e+00> : vector<16x16xf32>
    %40 = tpu.matmul %29, %38, %cst_18 {dimension_numbers = #tpu.dot_dimension_numbers<[1], [1], [0], [0], [0, 0, 1, 0], [], []>} : vector<16x32xf32>, vector<16x32xf32>, vector<16x16xf32> -> vector<16x16xf32>
    %cst_19 = arith.constant 0.176776692 : f32
    %41 = vector.broadcast %cst_19 : f32 to vector<16x16xf32>
    %42 = arith.mulf %40, %41 : vector<16x16xf32>
    %43 = vector.broadcast %20 : vector<1x16xf32> to vector<16x16xf32>
    %44 = arith.addf %42, %43 : vector<16x16xf32>
    %cst_20 = arith.constant dense<0xFF800000> : vector<16xf32>
    %45 = vector.multi_reduction <maximumf>, %44, %cst_20 [1] : vector<16x16xf32> to vector<16xf32>
    %46 = vector.shape_cast %45 : vector<16xf32> to vector<16x1xf32>
    %47 = vector.broadcast %46 : vector<16x1xf32> to vector<16x16xf32>
    %48 = arith.subf %44, %47 : vector<16x16xf32>
    %49 = math.exp %48 : vector<16x16xf32>
    %cst_21 = arith.constant dense<0.000000e+00> : vector<16xf32>
    %50 = vector.multi_reduction <add>, %49, %cst_21 [1] : vector<16x16xf32> to vector<16xf32>
    %51 = vector.shape_cast %50 : vector<16xf32> to vector<16x1xf32>
    %52 = vector.broadcast %51 : vector<16x1xf32> to vector<16x16xf32>
    %53 = arith.divf %49, %52 : vector<16x16xf32>
    %cst_22 = arith.constant dense<0.000000e+00> : vector<16x32xf32>
    %54 = tpu.matmul %53, %39, %cst_22 {dimension_numbers = #tpu.dot_dimension_numbers<[1], [0], [0], [1], [0, 0, 1, 1], [], []>} : vector<16x16xf32>, vector<16x32xf32>, vector<16x32xf32> -> vector<16x32xf32>
    %55 = vector.extract_strided_slice %16 {offsets = [0, 32], sizes = [16, 32], strides = [1, 1]} : vector<16x384xf32> to vector<16x32xf32>
    %56 = vector.extract_strided_slice %55 {offsets = [0, 16], sizes = [16, 16], strides = [1, 1]} : vector<16x32xf32> to vector<16x16xf32>
    %cst_23 = arith.constant 0.000000e+00 : f32
    %57 = vector.broadcast %cst_23 : f32 to vector<16x16xf32>
    %58 = arith.subf %57, %56 : vector<16x16xf32>
    %59 = vector.extract_strided_slice %55 {offsets = [0, 0], sizes = [16, 16], strides = [1, 1]} : vector<16x32xf32> to vector<16x16xf32>
    %60 = tpu.concatenate %58, %59 in 1 : vector<16x16xf32>, vector<16x16xf32> -> vector<16x32xf32>
    %61 = arith.mulf %55, %17 : vector<16x32xf32>
    %62 = arith.mulf %60, %18 : vector<16x32xf32>
    %63 = arith.addf %61, %62 : vector<16x32xf32>
    %64 = vector.extract_strided_slice %16 {offsets = [0, 160], sizes = [16, 32], strides = [1, 1]} : vector<16x384xf32> to vector<16x32xf32>
    %65 = vector.extract_strided_slice %64 {offsets = [0, 16], sizes = [16, 16], strides = [1, 1]} : vector<16x32xf32> to vector<16x16xf32>
    %cst_24 = arith.constant 0.000000e+00 : f32
    %66 = vector.broadcast %cst_24 : f32 to vector<16x16xf32>
    %67 = arith.subf %66, %65 : vector<16x16xf32>
    %68 = vector.extract_strided_slice %64 {offsets = [0, 0], sizes = [16, 16], strides = [1, 1]} : vector<16x32xf32> to vector<16x16xf32>
    %69 = tpu.concatenate %67, %68 in 1 : vector<16x16xf32>, vector<16x16xf32> -> vector<16x32xf32>
    %70 = arith.mulf %64, %17 : vector<16x32xf32>
    %71 = arith.mulf %69, %18 : vector<16x32xf32>
    %72 = arith.addf %70, %71 : vector<16x32xf32>
    %73 = vector.extract_strided_slice %16 {offsets = [0, 288], sizes = [16, 32], strides = [1, 1]} : vector<16x384xf32> to vector<16x32xf32>
    %cst_25 = arith.constant dense<0.000000e+00> : vector<16x16xf32>
    %74 = tpu.matmul %63, %72, %cst_25 {dimension_numbers = #tpu.dot_dimension_numbers<[1], [1], [0], [0], [0, 0, 1, 0], [], []>} : vector<16x32xf32>, vector<16x32xf32>, vector<16x16xf32> -> vector<16x16xf32>
    %cst_26 = arith.constant 0.176776692 : f32
    %75 = vector.broadcast %cst_26 : f32 to vector<16x16xf32>
    %76 = arith.mulf %74, %75 : vector<16x16xf32>
    %77 = vector.broadcast %20 : vector<1x16xf32> to vector<16x16xf32>
    %78 = arith.addf %76, %77 : vector<16x16xf32>
    %cst_27 = arith.constant dense<0xFF800000> : vector<16xf32>
    %79 = vector.multi_reduction <maximumf>, %78, %cst_27 [1] : vector<16x16xf32> to vector<16xf32>
    %80 = vector.shape_cast %79 : vector<16xf32> to vector<16x1xf32>
    %81 = vector.broadcast %80 : vector<16x1xf32> to vector<16x16xf32>
    %82 = arith.subf %78, %81 : vector<16x16xf32>
    %83 = math.exp %82 : vector<16x16xf32>
    %cst_28 = arith.constant dense<0.000000e+00> : vector<16xf32>
    %84 = vector.multi_reduction <add>, %83, %cst_28 [1] : vector<16x16xf32> to vector<16xf32>
    %85 = vector.shape_cast %84 : vector<16xf32> to vector<16x1xf32>
    %86 = vector.broadcast %85 : vector<16x1xf32> to vector<16x16xf32>
    %87 = arith.divf %83, %86 : vector<16x16xf32>
    %cst_29 = arith.constant dense<0.000000e+00> : vector<16x32xf32>
    %88 = tpu.matmul %87, %73, %cst_29 {dimension_numbers = #tpu.dot_dimension_numbers<[1], [0], [0], [1], [0, 0, 1, 1], [], []>} : vector<16x16xf32>, vector<16x32xf32>, vector<16x32xf32> -> vector<16x32xf32>
    %89 = vector.extract_strided_slice %16 {offsets = [0, 64], sizes = [16, 32], strides = [1, 1]} : vector<16x384xf32> to vector<16x32xf32>
    %90 = vector.extract_strided_slice %89 {offsets = [0, 16], sizes = [16, 16], strides = [1, 1]} : vector<16x32xf32> to vector<16x16xf32>
    %cst_30 = arith.constant 0.000000e+00 : f32
    %91 = vector.broadcast %cst_30 : f32 to vector<16x16xf32>
    %92 = arith.subf %91, %90 : vector<16x16xf32>
    %93 = vector.extract_strided_slice %89 {offsets = [0, 0], sizes = [16, 16], strides = [1, 1]} : vector<16x32xf32> to vector<16x16xf32>
    %94 = tpu.concatenate %92, %93 in 1 : vector<16x16xf32>, vector<16x16xf32> -> vector<16x32xf32>
    %95 = arith.mulf %89, %17 : vector<16x32xf32>
    %96 = arith.mulf %94, %18 : vector<16x32xf32>
    %97 = arith.addf %95, %96 : vector<16x32xf32>
    %98 = vector.extract_strided_slice %16 {offsets = [0, 192], sizes = [16, 32], strides = [1, 1]} : vector<16x384xf32> to vector<16x32xf32>
    %99 = vector.extract_strided_slice %98 {offsets = [0, 16], sizes = [16, 16], strides = [1, 1]} : vector<16x32xf32> to vector<16x16xf32>
    %cst_31 = arith.constant 0.000000e+00 : f32
    %100 = vector.broadcast %cst_31 : f32 to vector<16x16xf32>
    %101 = arith.subf %100, %99 : vector<16x16xf32>
    %102 = vector.extract_strided_slice %98 {offsets = [0, 0], sizes = [16, 16], strides = [1, 1]} : vector<16x32xf32> to vector<16x16xf32>
    %103 = tpu.concatenate %101, %102 in 1 : vector<16x16xf32>, vector<16x16xf32> -> vector<16x32xf32>
    %104 = arith.mulf %98, %17 : vector<16x32xf32>
    %105 = arith.mulf %103, %18 : vector<16x32xf32>
    %106 = arith.addf %104, %105 : vector<16x32xf32>
    %107 = vector.extract_strided_slice %16 {offsets = [0, 320], sizes = [16, 32], strides = [1, 1]} : vector<16x384xf32> to vector<16x32xf32>
    %cst_32 = arith.constant dense<0.000000e+00> : vector<16x16xf32>
    %108 = tpu.matmul %97, %106, %cst_32 {dimension_numbers = #tpu.dot_dimension_numbers<[1], [1], [0], [0], [0, 0, 1, 0], [], []>} : vector<16x32xf32>, vector<16x32xf32>, vector<16x16xf32> -> vector<16x16xf32>
    %cst_33 = arith.constant 0.176776692 : f32
    %109 = vector.broadcast %cst_33 : f32 to vector<16x16xf32>
    %110 = arith.mulf %108, %109 : vector<16x16xf32>
    %111 = vector.broadcast %20 : vector<1x16xf32> to vector<16x16xf32>
    %112 = arith.addf %110, %111 : vector<16x16xf32>
    %cst_34 = arith.constant dense<0xFF800000> : vector<16xf32>
    %113 = vector.multi_reduction <maximumf>, %112, %cst_34 [1] : vector<16x16xf32> to vector<16xf32>
    %114 = vector.shape_cast %113 : vector<16xf32> to vector<16x1xf32>
    %115 = vector.broadcast %114 : vector<16x1xf32> to vector<16x16xf32>
    %116 = arith.subf %112, %115 : vector<16x16xf32>
    %117 = math.exp %116 : vector<16x16xf32>
    %cst_35 = arith.constant dense<0.000000e+00> : vector<16xf32>
    %118 = vector.multi_reduction <add>, %117, %cst_35 [1] : vector<16x16xf32> to vector<16xf32>
    %119 = vector.shape_cast %118 : vector<16xf32> to vector<16x1xf32>
    %120 = vector.broadcast %119 : vector<16x1xf32> to vector<16x16xf32>
    %121 = arith.divf %117, %120 : vector<16x16xf32>
    %cst_36 = arith.constant dense<0.000000e+00> : vector<16x32xf32>
    %122 = tpu.matmul %121, %107, %cst_36 {dimension_numbers = #tpu.dot_dimension_numbers<[1], [0], [0], [1], [0, 0, 1, 1], [], []>} : vector<16x16xf32>, vector<16x32xf32>, vector<16x32xf32> -> vector<16x32xf32>
    %123 = vector.extract_strided_slice %16 {offsets = [0, 96], sizes = [16, 32], strides = [1, 1]} : vector<16x384xf32> to vector<16x32xf32>
    %124 = vector.extract_strided_slice %123 {offsets = [0, 16], sizes = [16, 16], strides = [1, 1]} : vector<16x32xf32> to vector<16x16xf32>
    %cst_37 = arith.constant 0.000000e+00 : f32
    %125 = vector.broadcast %cst_37 : f32 to vector<16x16xf32>
    %126 = arith.subf %125, %124 : vector<16x16xf32>
    %127 = vector.extract_strided_slice %123 {offsets = [0, 0], sizes = [16, 16], strides = [1, 1]} : vector<16x32xf32> to vector<16x16xf32>
    %128 = tpu.concatenate %126, %127 in 1 : vector<16x16xf32>, vector<16x16xf32> -> vector<16x32xf32>
    %129 = arith.mulf %123, %17 : vector<16x32xf32>
    %130 = arith.mulf %128, %18 : vector<16x32xf32>
    %131 = arith.addf %129, %130 : vector<16x32xf32>
    %132 = vector.extract_strided_slice %16 {offsets = [0, 224], sizes = [16, 32], strides = [1, 1]} : vector<16x384xf32> to vector<16x32xf32>
    %133 = vector.extract_strided_slice %132 {offsets = [0, 16], sizes = [16, 16], strides = [1, 1]} : vector<16x32xf32> to vector<16x16xf32>
    %cst_38 = arith.constant 0.000000e+00 : f32
    %134 = vector.broadcast %cst_38 : f32 to vector<16x16xf32>
    %135 = arith.subf %134, %133 : vector<16x16xf32>
    %136 = vector.extract_strided_slice %132 {offsets = [0, 0], sizes = [16, 16], strides = [1, 1]} : vector<16x32xf32> to vector<16x16xf32>
    %137 = tpu.concatenate %135, %136 in 1 : vector<16x16xf32>, vector<16x16xf32> -> vector<16x32xf32>
    %138 = arith.mulf %132, %17 : vector<16x32xf32>
    %139 = arith.mulf %137, %18 : vector<16x32xf32>
    %140 = arith.addf %138, %139 : vector<16x32xf32>
    %141 = vector.extract_strided_slice %16 {offsets = [0, 352], sizes = [16, 32], strides = [1, 1]} : vector<16x384xf32> to vector<16x32xf32>
    %cst_39 = arith.constant dense<0.000000e+00> : vector<16x16xf32>
    %142 = tpu.matmul %131, %140, %cst_39 {dimension_numbers = #tpu.dot_dimension_numbers<[1], [1], [0], [0], [0, 0, 1, 0], [], []>} : vector<16x32xf32>, vector<16x32xf32>, vector<16x16xf32> -> vector<16x16xf32>
    %cst_40 = arith.constant 0.176776692 : f32
    %143 = vector.broadcast %cst_40 : f32 to vector<16x16xf32>
    %144 = arith.mulf %142, %143 : vector<16x16xf32>
    %145 = vector.broadcast %20 : vector<1x16xf32> to vector<16x16xf32>
    %146 = arith.addf %144, %145 : vector<16x16xf32>
    %cst_41 = arith.constant dense<0xFF800000> : vector<16xf32>
    %147 = vector.multi_reduction <maximumf>, %146, %cst_41 [1] : vector<16x16xf32> to vector<16xf32>
    %148 = vector.shape_cast %147 : vector<16xf32> to vector<16x1xf32>
    %149 = vector.broadcast %148 : vector<16x1xf32> to vector<16x16xf32>
    %150 = arith.subf %146, %149 : vector<16x16xf32>
    %151 = math.exp %150 : vector<16x16xf32>
    %cst_42 = arith.constant dense<0.000000e+00> : vector<16xf32>
    %152 = vector.multi_reduction <add>, %151, %cst_42 [1] : vector<16x16xf32> to vector<16xf32>
    %153 = vector.shape_cast %152 : vector<16xf32> to vector<16x1xf32>
    %154 = vector.broadcast %153 : vector<16x1xf32> to vector<16x16xf32>
    %155 = arith.divf %151, %154 : vector<16x16xf32>
    %cst_43 = arith.constant dense<0.000000e+00> : vector<16x32xf32>
    %156 = tpu.matmul %155, %141, %cst_43 {dimension_numbers = #tpu.dot_dimension_numbers<[1], [0], [0], [1], [0, 0, 1, 1], [], []>} : vector<16x16xf32>, vector<16x32xf32>, vector<16x32xf32> -> vector<16x32xf32>
    %157 = tpu.concatenate %54, %88, %122, %156 in 1 : vector<16x32xf32>, vector<16x32xf32>, vector<16x32xf32>, vector<16x32xf32> -> vector<16x128xf32>
    %c0_44 = arith.constant 0 : index
    %c0_45 = arith.constant 0 : index
    %158 = vector.load %arg4[%c0_44, %c0_45] : memref<128x128xf32, #tpu.memory_space<vmem>>, vector<128x128xf32>
    %cst_46 = arith.constant dense<0.000000e+00> : vector<16x128xf32>
    %159 = tpu.matmul %157, %158, %cst_46 {dimension_numbers = #tpu.dot_dimension_numbers<[1], [0], [0], [1], [0, 0, 1, 1], [], []>} : vector<16x128xf32>, vector<128x128xf32>, vector<16x128xf32> -> vector<16x128xf32>
    %160 = arith.addf %1, %159 : vector<16x128xf32>
    %c0_47 = arith.constant 0 : index
    %c0_48 = arith.constant 0 : index
    %c0_49 = arith.constant 0 : index
    %161 = vector.load %arg8[%c0_47, %c0_48, %c0_49] : memref<1x16x128xf32, #tpu.memory_space<vmem>>, vector<1x16x128xf32>
    %162 = vector.shape_cast %161 : vector<1x16x128xf32> to vector<16x128xf32>
    %163 = vector.shape_cast %160 : vector<16x128xf32> to vector<1x16x128xf32>
    tpu.vector_store %arg8[%c0_47, %c0_48, %c0_49], %163 {strides = array<i32>} : memref<1x16x128xf32, #tpu.memory_space<vmem>>, vector<1x16x128xf32>,
    return
  }
  func.func @transform_0(%arg0: i32) -> (i32, i32, i32) {
    %c0_i32 = arith.constant 0 : i32
    %c0_i32_0 = arith.constant 0 : i32
    %c0_i32_1 = arith.constant 0 : i32
    return %arg0, %c0_i32, %c0_i32_0 : i32, i32, i32
  }
  func.func @transform_1(%arg0: i32) -> (i32, i32) {
    %c0_i32 = arith.constant 0 : i32
    %c0_i32_0 = arith.constant 0 : i32
    %c0_i32_1 = arith.constant 0 : i32
    return %c0_i32, %c0_i32_0 : i32, i32
  }
  func.func @transform_2(%arg0: i32) -> (i32, i32) {
    %c0_i32 = arith.constant 0 : i32
    %c0_i32_0 = arith.constant 0 : i32
    %c0_i32_1 = arith.constant 0 : i32
    return %c0_i32, %c0_i32_0 : i32, i32
  }
  func.func @transform_3(%arg0: i32) -> (i32, i32) {
    %c0_i32 = arith.constant 0 : i32
    %c0_i32_0 = arith.constant 0 : i32
    %c0_i32_1 = arith.constant 0 : i32
    return %c0_i32, %c0_i32_0 : i32, i32
  }
  func.func @transform_4(%arg0: i32) -> (i32, i32) {
    %c0_i32 = arith.constant 0 : i32
    %c0_i32_0 = arith.constant 0 : i32
    %c0_i32_1 = arith.constant 0 : i32
    return %c0_i32, %c0_i32_0 : i32, i32
  }
  func.func @transform_5(%arg0: i32) -> (i32, i32) {
    %c0_i32 = arith.constant 0 : i32
    %c0_i32_0 = arith.constant 0 : i32
    %c0_i32_1 = arith.constant 0 : i32
    return %c0_i32, %c0_i32_0 : i32, i32
  }
  func.func @transform_6(%arg0: i32) -> (i32, i32, i32) {
    %c0_i32 = arith.constant 0 : i32
    %c0_i32_0 = arith.constant 0 : i32
    %c0_i32_1 = arith.constant 0 : i32
    return %arg0, %c0_i32, %c0_i32_0 : i32, i32, i32
  }
  func.func @transform_7(%arg0: i32) -> (i32, i32, i32) {
    %c0_i32 = arith.constant 0 : i32
    %c0_i32_0 = arith.constant 0 : i32
    %c0_i32_1 = arith.constant 0 : i32
    return %arg0, %c0_i32, %c0_i32_0 : i32, i32, i32
  }
}

module attributes {stable_mosaic.version = 11 : i64} {
  func.func @_ffn_block_kernel(%arg0: i32, %arg1: memref<16x128xf32, #tpu.memory_space<vmem>>, %arg2: memref<1x128xf32, #tpu.memory_space<vmem>>, %arg3: memref<128x512xf32, #tpu.memory_space<vmem>>, %arg4: memref<256x128xf32, #tpu.memory_space<vmem>>, %arg5: memref<16x128xf32, #tpu.memory_space<vmem>>) attributes {dimension_semantics = [#tpu.dimension_semantics<parallel>], iteration_bounds = array<i64: 2>, scalar_prefetch = 0 : i64, scratch_operands = 0 : i64, tpu.core_type = #tpu.core_type<tc>, window_params = [{transform_indices = @transform_0, window_bounds = array<i64: 16, 128>}, {pipeline_mode = #tpu.pipeline_mode<synchronous>, transform_indices = @transform_1, window_bounds = array<i64: 1, 128>}, {pipeline_mode = #tpu.pipeline_mode<synchronous>, transform_indices = @transform_2, window_bounds = array<i64: 128, 512>}, {pipeline_mode = #tpu.pipeline_mode<synchronous>, transform_indices = @transform_3, window_bounds = array<i64: 256, 128>}, {transform_indices = @transform_4, window_bounds = array<i64: 16, 128>}]} {
    %c0 = arith.constant 0 : index
    %c0_0 = arith.constant 0 : index
    %0 = vector.load %arg1[%c0, %c0_0] : memref<16x128xf32, #tpu.memory_space<vmem>>, vector<16x128xf32>
    %c0_1 = arith.constant 0 : index
    %c0_2 = arith.constant 0 : index
    %1 = vector.load %arg2[%c0_1, %c0_2] : memref<1x128xf32, #tpu.memory_space<vmem>>, vector<1x128xf32>
    %2 = arith.mulf %0, %0 : vector<16x128xf32>
    %cst = arith.constant dense<0.000000e+00> : vector<16xf32>
    %3 = vector.multi_reduction <add>, %2, %cst [1] : vector<16x128xf32> to vector<16xf32>
    %4 = vector.shape_cast %3 : vector<16xf32> to vector<16x1xf32>
    %cst_3 = arith.constant 1.280000e+02 : f32
    %5 = vector.broadcast %cst_3 : f32 to vector<16x1xf32>
    %6 = arith.divf %4, %5 : vector<16x1xf32>
    %cst_4 = arith.constant 9.99999974E-6 : f32
    %7 = vector.broadcast %cst_4 : f32 to vector<16x1xf32>
    %8 = arith.addf %6, %7 : vector<16x1xf32>
    %9 = math.rsqrt %8 : vector<16x1xf32>
    %10 = vector.broadcast %9 : vector<16x1xf32> to vector<16x128xf32>
    %11 = arith.mulf %0, %10 : vector<16x128xf32>
    %12 = vector.broadcast %1 : vector<1x128xf32> to vector<16x128xf32>
    %13 = arith.mulf %11, %12 : vector<16x128xf32>
    %c0_5 = arith.constant 0 : index
    %c0_6 = arith.constant 0 : index
    %14 = vector.load %arg3[%c0_5, %c0_6] : memref<128x512xf32, #tpu.memory_space<vmem>>, vector<128x512xf32>
    %cst_7 = arith.constant dense<0.000000e+00> : vector<16x512xf32>
    %15 = tpu.matmul %13, %14, %cst_7 {dimension_numbers = #tpu.dot_dimension_numbers<[1], [0], [0], [1], [0, 0, 1, 1], [], []>} : vector<16x128xf32>, vector<128x512xf32>, vector<16x512xf32> -> vector<16x512xf32>
    %16 = vector.extract_strided_slice %15 {offsets = [0, 0], sizes = [16, 256], strides = [1, 1]} : vector<16x512xf32> to vector<16x256xf32>
    %17 = vector.extract_strided_slice %15 {offsets = [0, 256], sizes = [16, 256], strides = [1, 1]} : vector<16x512xf32> to vector<16x256xf32>
    %18 = arith.negf %16 : vector<16x256xf32>
    %19 = math.exp %18 : vector<16x256xf32>
    %cst_8 = arith.constant 1.000000e+00 : f32
    %20 = vector.broadcast %cst_8 : f32 to vector<16x256xf32>
    %21 = arith.addf %20, %19 : vector<16x256xf32>
    %22 = arith.divf %20, %21 : vector<16x256xf32>
    %23 = arith.mulf %16, %22 : vector<16x256xf32>
    %24 = arith.mulf %23, %17 : vector<16x256xf32>
    %c0_9 = arith.constant 0 : index
    %c0_10 = arith.constant 0 : index
    %25 = vector.load %arg4[%c0_9, %c0_10] : memref<256x128xf32, #tpu.memory_space<vmem>>, vector<256x128xf32>
    %cst_11 = arith.constant dense<0.000000e+00> : vector<16x128xf32>
    %26 = tpu.matmul %24, %25, %cst_11 {dimension_numbers = #tpu.dot_dimension_numbers<[1], [0], [0], [1], [0, 0, 1, 1], [], []>} : vector<16x256xf32>, vector<256x128xf32>, vector<16x128xf32> -> vector<16x128xf32>
    %27 = arith.addf %0, %26 : vector<16x128xf32>
    %c0_12 = arith.constant 0 : index
    %c0_13 = arith.constant 0 : index
    %28 = vector.load %arg5[%c0_12, %c0_13] : memref<16x128xf32, #tpu.memory_space<vmem>>, vector<16x128xf32>
    tpu.vector_store %arg5[%c0_12, %c0_13], %27 {strides = array<i32>} : memref<16x128xf32, #tpu.memory_space<vmem>>, vector<16x128xf32>,
    return
  }
  func.func @transform_0(%arg0: i32) -> (i32, i32) {
    %c0_i32 = arith.constant 0 : i32
    %c0_i32_0 = arith.constant 0 : i32
    return %arg0, %c0_i32 : i32, i32
  }
  func.func @transform_1(%arg0: i32) -> (i32, i32) {
    %c0_i32 = arith.constant 0 : i32
    %c0_i32_0 = arith.constant 0 : i32
    %c0_i32_1 = arith.constant 0 : i32
    return %c0_i32, %c0_i32_0 : i32, i32
  }
  func.func @transform_2(%arg0: i32) -> (i32, i32) {
    %c0_i32 = arith.constant 0 : i32
    %c0_i32_0 = arith.constant 0 : i32
    %c0_i32_1 = arith.constant 0 : i32
    return %c0_i32, %c0_i32_0 : i32, i32
  }
  func.func @transform_3(%arg0: i32) -> (i32, i32) {
    %c0_i32 = arith.constant 0 : i32
    %c0_i32_0 = arith.constant 0 : i32
    %c0_i32_1 = arith.constant 0 : i32
    return %c0_i32, %c0_i32_0 : i32, i32
  }
  func.func @transform_4(%arg0: i32) -> (i32, i32) {
    %c0_i32 = arith.constant 0 : i32
    %c0_i32_0 = arith.constant 0 : i32
    return %arg0, %c0_i32 : i32, i32
  }
}

module attributes {stable_mosaic.version = 11 : i64} {
  func.func @_att_agg_kernel(%arg0: i32, %arg1: memref<1x16x128xf32, #tpu.memory_space<vmem>>, %arg2: memref<1x128xf32, #tpu.memory_space<vmem>>, %arg3: memref<1x128xf32, #tpu.memory_space<vmem>>, %arg4: memref<128x384xf32, #tpu.memory_space<vmem>>, %arg5: memref<16x16xf32, #tpu.memory_space<vmem>>, %arg6: memref<1x1x16xf32, #tpu.memory_space<vmem>>, %arg7: memref<1x128xf32, #tpu.memory_space<vmem>>, %arg8: memref<1x1x128xf32, #tpu.memory_space<vmem>>) attributes {dimension_semantics = [#tpu.dimension_semantics<parallel>], iteration_bounds = array<i64: 2>, scalar_prefetch = 0 : i64, scratch_operands = 0 : i64, tpu.core_type = #tpu.core_type<tc>, window_params = [{transform_indices = @transform_0, window_bounds = array<i64: 1, 16, 128>}, {pipeline_mode = #tpu.pipeline_mode<synchronous>, transform_indices = @transform_1, window_bounds = array<i64: 1, 128>}, {pipeline_mode = #tpu.pipeline_mode<synchronous>, transform_indices = @transform_2, window_bounds = array<i64: 1, 128>}, {pipeline_mode = #tpu.pipeline_mode<synchronous>, transform_indices = @transform_3, window_bounds = array<i64: 128, 384>}, {pipeline_mode = #tpu.pipeline_mode<synchronous>, transform_indices = @transform_4, window_bounds = array<i64: 16, 16>}, {transform_indices = @transform_5, window_bounds = array<i64: 1, 1, 16>}, {pipeline_mode = #tpu.pipeline_mode<synchronous>, transform_indices = @transform_6, window_bounds = array<i64: 1, 128>}, {transform_indices = @transform_7, window_bounds = array<i64: 1, 1, 128>}]} {
    %c0 = arith.constant 0 : index
    %c0_0 = arith.constant 0 : index
    %c0_1 = arith.constant 0 : index
    %0 = vector.load %arg1[%c0, %c0_0, %c0_1] : memref<1x16x128xf32, #tpu.memory_space<vmem>>, vector<1x16x128xf32>
    %1 = vector.shape_cast %0 : vector<1x16x128xf32> to vector<16x128xf32>
    %c0_2 = arith.constant 0 : index
    %c0_3 = arith.constant 0 : index
    %2 = vector.load %arg2[%c0_2, %c0_3] : memref<1x128xf32, #tpu.memory_space<vmem>>, vector<1x128xf32>
    %3 = arith.mulf %1, %1 : vector<16x128xf32>
    %cst = arith.constant dense<0.000000e+00> : vector<16xf32>
    %4 = vector.multi_reduction <add>, %3, %cst [1] : vector<16x128xf32> to vector<16xf32>
    %5 = vector.shape_cast %4 : vector<16xf32> to vector<16x1xf32>
    %cst_4 = arith.constant 1.280000e+02 : f32
    %6 = vector.broadcast %cst_4 : f32 to vector<16x1xf32>
    %7 = arith.divf %5, %6 : vector<16x1xf32>
    %cst_5 = arith.constant 9.99999974E-6 : f32
    %8 = vector.broadcast %cst_5 : f32 to vector<16x1xf32>
    %9 = arith.addf %7, %8 : vector<16x1xf32>
    %10 = math.rsqrt %9 : vector<16x1xf32>
    %11 = vector.broadcast %10 : vector<16x1xf32> to vector<16x128xf32>
    %12 = arith.mulf %1, %11 : vector<16x128xf32>
    %13 = vector.broadcast %2 : vector<1x128xf32> to vector<16x128xf32>
    %14 = arith.mulf %12, %13 : vector<16x128xf32>
    %c0_6 = arith.constant 0 : index
    %c0_7 = arith.constant 0 : index
    %15 = vector.load %arg3[%c0_6, %c0_7] : memref<1x128xf32, #tpu.memory_space<vmem>>, vector<1x128xf32>
    %16 = arith.mulf %14, %14 : vector<16x128xf32>
    %cst_8 = arith.constant dense<0.000000e+00> : vector<16xf32>
    %17 = vector.multi_reduction <add>, %16, %cst_8 [1] : vector<16x128xf32> to vector<16xf32>
    %18 = vector.shape_cast %17 : vector<16xf32> to vector<16x1xf32>
    %cst_9 = arith.constant 1.280000e+02 : f32
    %19 = vector.broadcast %cst_9 : f32 to vector<16x1xf32>
    %20 = arith.divf %18, %19 : vector<16x1xf32>
    %cst_10 = arith.constant 9.99999974E-6 : f32
    %21 = vector.broadcast %cst_10 : f32 to vector<16x1xf32>
    %22 = arith.addf %20, %21 : vector<16x1xf32>
    %23 = math.rsqrt %22 : vector<16x1xf32>
    %24 = vector.broadcast %23 : vector<16x1xf32> to vector<16x128xf32>
    %25 = arith.mulf %14, %24 : vector<16x128xf32>
    %26 = vector.broadcast %15 : vector<1x128xf32> to vector<16x128xf32>
    %27 = arith.mulf %25, %26 : vector<16x128xf32>
    %c0_11 = arith.constant 0 : index
    %c0_12 = arith.constant 0 : index
    %28 = vector.load %arg4[%c0_11, %c0_12] : memref<128x384xf32, #tpu.memory_space<vmem>>, vector<128x384xf32>
    %cst_13 = arith.constant dense<0.000000e+00> : vector<16x384xf32>
    %29 = tpu.matmul %27, %28, %cst_13 {dimension_numbers = #tpu.dot_dimension_numbers<[1], [0], [0], [1], [0, 0, 1, 1], [], []>} : vector<16x128xf32>, vector<128x384xf32>, vector<16x384xf32> -> vector<16x384xf32>
    %30 = vector.extract_strided_slice %29 {offsets = [0, 0], sizes = [16, 128], strides = [1, 1]} : vector<16x384xf32> to vector<16x128xf32>
    %31 = vector.extract_strided_slice %29 {offsets = [0, 128], sizes = [16, 128], strides = [1, 1]} : vector<16x384xf32> to vector<16x128xf32>
    %32 = vector.extract_strided_slice %29 {offsets = [0, 256], sizes = [16, 128], strides = [1, 1]} : vector<16x384xf32> to vector<16x128xf32>
    %c0_14 = arith.constant 0 : index
    %c0_15 = arith.constant 0 : index
    %c0_16 = arith.constant 0 : index
    %33 = vector.load %arg6[%c0_14, %c0_15, %c0_16] : memref<1x1x16xf32, #tpu.memory_space<vmem>>, vector<1x1x16xf32>
    %34 = vector.shape_cast %33 : vector<1x1x16xf32> to vector<1x16xf32>
    %cst_17 = arith.constant dense<0.000000e+00> : vector<16x16xf32>
    %35 = tpu.matmul %30, %31, %cst_17 {dimension_numbers = #tpu.dot_dimension_numbers<[1], [1], [0], [0], [0, 0, 1, 0], [], []>} : vector<16x128xf32>, vector<16x128xf32>, vector<16x16xf32> -> vector<16x16xf32>
    %c0_18 = arith.constant 0 : index
    %c0_19 = arith.constant 0 : index
    %36 = vector.load %arg5[%c0_18, %c0_19] : memref<16x16xf32, #tpu.memory_space<vmem>>, vector<16x16xf32>
    %37 = arith.addf %35, %36 : vector<16x16xf32>
    %cst_20 = arith.constant 5.000000e-01 : f32
    %38 = vector.broadcast %cst_20 : f32 to vector<1x16xf32>
    %39 = arith.cmpf ogt, %34, %38 : vector<1x16xf32>
    %cst_21 = arith.constant -1.000000e+09 : f32
    %40 = vector.shape_cast %39 : vector<1x16xi1> to vector<1x16xi1>
    %41 = vector.broadcast %40 : vector<1x16xi1> to vector<16x16xi1>
    %42 = vector.broadcast %cst_21 : f32 to vector<16x16xf32>
    %43 = arith.select %41, %37, %42 : vector<16x16xi1>, vector<16x16xf32>
    %cst_22 = arith.constant dense<0xFF800000> : vector<16xf32>
    %44 = vector.multi_reduction <maximumf>, %43, %cst_22 [1] : vector<16x16xf32> to vector<16xf32>
    %45 = vector.shape_cast %44 : vector<16xf32> to vector<16x1xf32>
    %46 = vector.broadcast %45 : vector<16x1xf32> to vector<16x16xf32>
    %47 = arith.subf %43, %46 : vector<16x16xf32>
    %48 = math.exp %47 : vector<16x16xf32>
    %cst_23 = arith.constant dense<0.000000e+00> : vector<16xf32>
    %49 = vector.multi_reduction <add>, %48, %cst_23 [1] : vector<16x16xf32> to vector<16xf32>
    %50 = vector.shape_cast %49 : vector<16xf32> to vector<16x1xf32>
    %51 = vector.broadcast %50 : vector<16x1xf32> to vector<16x16xf32>
    %52 = arith.divf %48, %51 : vector<16x16xf32>
    %cst_24 = arith.constant dense<0.000000e+00> : vector<16x128xf32>
    %53 = tpu.matmul %52, %32, %cst_24 {dimension_numbers = #tpu.dot_dimension_numbers<[1], [0], [0], [1], [0, 0, 1, 1], [], []>} : vector<16x16xf32>, vector<16x128xf32>, vector<16x128xf32> -> vector<16x128xf32>
    %c0_25 = arith.constant 0 : index
    %c0_26 = arith.constant 0 : index
    %54 = vector.load %arg7[%c0_25, %c0_26] : memref<1x128xf32, #tpu.memory_space<vmem>>, vector<1x128xf32>
    %cst_27 = arith.constant dense<0.000000e+00> : vector<1x16xf32>
    %55 = tpu.matmul %54, %53, %cst_27 {dimension_numbers = #tpu.dot_dimension_numbers<[1], [1], [0], [0], [0, 0, 1, 0], [], []>} : vector<1x128xf32>, vector<16x128xf32>, vector<1x16xf32> -> vector<1x16xf32>
    %cst_28 = arith.constant 5.000000e-01 : f32
    %56 = vector.broadcast %cst_28 : f32 to vector<1x16xf32>
    %57 = arith.cmpf ogt, %34, %56 : vector<1x16xf32>
    %cst_29 = arith.constant -1.000000e+09 : f32
    %58 = vector.broadcast %cst_29 : f32 to vector<1x16xf32>
    %59 = arith.select %57, %55, %58 : vector<1x16xi1>, vector<1x16xf32>
    %cst_30 = arith.constant dense<0xFF800000> : vector<1xf32>
    %60 = vector.multi_reduction <maximumf>, %59, %cst_30 [1] : vector<1x16xf32> to vector<1xf32>
    %61 = vector.shape_cast %60 : vector<1xf32> to vector<1x1xf32>
    %62 = vector.broadcast %61 : vector<1x1xf32> to vector<1x16xf32>
    %63 = arith.subf %59, %62 : vector<1x16xf32>
    %64 = math.exp %63 : vector<1x16xf32>
    %cst_31 = arith.constant dense<0.000000e+00> : vector<1xf32>
    %65 = vector.multi_reduction <add>, %64, %cst_31 [1] : vector<1x16xf32> to vector<1xf32>
    %66 = vector.shape_cast %65 : vector<1xf32> to vector<1x1xf32>
    %67 = vector.broadcast %66 : vector<1x1xf32> to vector<1x16xf32>
    %68 = arith.divf %64, %67 : vector<1x16xf32>
    %cst_32 = arith.constant dense<0.000000e+00> : vector<1x128xf32>
    %69 = tpu.matmul %68, %53, %cst_32 {dimension_numbers = #tpu.dot_dimension_numbers<[1], [0], [0], [1], [0, 0, 1, 1], [], []>} : vector<1x16xf32>, vector<16x128xf32>, vector<1x128xf32> -> vector<1x128xf32>
    %c0_33 = arith.constant 0 : index
    %c0_34 = arith.constant 0 : index
    %c0_35 = arith.constant 0 : index
    %70 = vector.load %arg8[%c0_33, %c0_34, %c0_35] : memref<1x1x128xf32, #tpu.memory_space<vmem>>, vector<1x1x128xf32>
    %71 = vector.shape_cast %70 : vector<1x1x128xf32> to vector<1x128xf32>
    %72 = vector.shape_cast %69 : vector<1x128xf32> to vector<1x1x128xf32>
    tpu.vector_store %arg8[%c0_33, %c0_34, %c0_35], %72 {strides = array<i32>} : memref<1x1x128xf32, #tpu.memory_space<vmem>>, vector<1x1x128xf32>,
    return
  }
  func.func @transform_0(%arg0: i32) -> (i32, i32, i32) {
    %c0_i32 = arith.constant 0 : i32
    %c0_i32_0 = arith.constant 0 : i32
    %c0_i32_1 = arith.constant 0 : i32
    return %arg0, %c0_i32, %c0_i32_0 : i32, i32, i32
  }
  func.func @transform_1(%arg0: i32) -> (i32, i32) {
    %c0_i32 = arith.constant 0 : i32
    %c0_i32_0 = arith.constant 0 : i32
    %c0_i32_1 = arith.constant 0 : i32
    return %c0_i32, %c0_i32_0 : i32, i32
  }
  func.func @transform_2(%arg0: i32) -> (i32, i32) {
    %c0_i32 = arith.constant 0 : i32
    %c0_i32_0 = arith.constant 0 : i32
    %c0_i32_1 = arith.constant 0 : i32
    return %c0_i32, %c0_i32_0 : i32, i32
  }
  func.func @transform_3(%arg0: i32) -> (i32, i32) {
    %c0_i32 = arith.constant 0 : i32
    %c0_i32_0 = arith.constant 0 : i32
    %c0_i32_1 = arith.constant 0 : i32
    return %c0_i32, %c0_i32_0 : i32, i32
  }
  func.func @transform_4(%arg0: i32) -> (i32, i32) {
    %c0_i32 = arith.constant 0 : i32
    %c0_i32_0 = arith.constant 0 : i32
    %c0_i32_1 = arith.constant 0 : i32
    return %c0_i32, %c0_i32_0 : i32, i32
  }
  func.func @transform_5(%arg0: i32) -> (i32, i32, i32) {
    %c0_i32 = arith.constant 0 : i32
    %c0_i32_0 = arith.constant 0 : i32
    %c0_i32_1 = arith.constant 0 : i32
    return %arg0, %c0_i32, %c0_i32_0 : i32, i32, i32
  }
  func.func @transform_6(%arg0: i32) -> (i32, i32) {
    %c0_i32 = arith.constant 0 : i32
    %c0_i32_0 = arith.constant 0 : i32
    %c0_i32_1 = arith.constant 0 : i32
    return %c0_i32, %c0_i32_0 : i32, i32
  }
  func.func @transform_7(%arg0: i32) -> (i32, i32, i32) {
    %c0_i32 = arith.constant 0 : i32
    %c0_i32_0 = arith.constant 0 : i32
    %c0_i32_1 = arith.constant 0 : i32
    return %arg0, %c0_i32, %c0_i32_0 : i32, i32, i32
  }
}

</mosaic_0001>

<bundles_post_ra>
// kernel: _lambda_.6
= control target key start
LH: loop header
LB: loop body
LE: loop exit
PB: predicated region body
PF: predicated region fallthrough
CT: control target
= control target key end

     0   :  { %s873_s15 = smov 0   ;;  %s1200_s0 = inlined_call_operand.vmem [shape: f32[32,128], index: 0, kind: input, shape index: {}]   ;;  %s1201_s1 = inlined_call_operand.vmem [shape: f32[1,128], index: 1, kind: input, shape index: {}]   ;;  %s1202_s2 = inlined_call_operand.vmem [shape: f32[128,512], index: 2, kind: input, shape index: {}]   ;;  %s1203_s3 = inlined_call_operand.vmem [shape: f32[256,128], index: 3, kind: input, shape index: {}]   ;;  %s1204_s4 = inlined_call_operand.vmem [shape: f32[32,128], index: 4, kind: output, shape index: {}]  }
   0x1 LB: > { %s644_s16 = sadd.s32 4294967295, %s845_s15   ;;  %p648_p0 = scmp.ge.s32.totalorder %s845_s15, 1  ;;  %s845_s15 = sphi %s873_s15, %s14_s15  }
   0x2   : > { %p163_p1 = scmp.lt.s32.totalorder %s845_s15, 3 }
   0x4   : > { %p164_p2 = pnand %p648_p0, %p163_p1 }
   0x5   : > { %s649_s17 = sshll.u32 (!%p164_p2), %s644_s16, 1  ;;  %v228_v0 = vld [vmem:[%s1202_s2 + $0x8] sm:$0xff] (!%p164_p2)  ;;  %v230_v2 = vld [vmem:[%s1202_s2 + $0x18] sm:$0xff] (!%p164_p2)  ;;  %v227_v5 = vld [vmem:[%s1202_s2] sm:$0xff] (!%p164_p2) }
   0x6   : > { %167 = sbr.rel (%p164_p2) target bundleno = 646 (0x286), region = 36  ;;  %v232_v1 = vld [vmem:[%s1202_s2 + $0x28] sm:$0xff] (!%p164_p2)  ;;  %p190_p3 = scmp.lt.s32.totalorder (!%p164_p2), %s649_s17, 3  ;;  %v234_v4 = vld [vmem:[%s1202_s2 + $0x38] sm:$0xff] (!%p164_p2)  ;;  %v231_v6 = vld [vmem:[%s1202_s2 + $0x20] sm:$0xff] (!%p164_p2) }
   0x7   : > { %v698_v3 = vpack.c.bf16 (!%p164_p2), %v232_v1, %v228_v0  ;;  %v730_v7 = vpack.c.bf16 (!%p164_p2), %v234_v4, %v230_v2  ;;  %v700_v8 = vpack.c.bf16 (!%p164_p2), %v231_v6, %v227_v5  ;;  %v229_v9 = vld [vmem:[%s1202_s2 + $0x10] sm:$0xff] (!%p164_p2)  ;;  %v236_v11 = vld [vmem:[%s1202_s2 + $0x48] sm:$0xff] (!%p164_p2)  ;;  %v238_v14 = vld [vmem:[%s1202_s2 + $0x58] sm:$0xff] (!%p164_p2) }
   0x8   : > { %v233_v10 = vld [vmem:[%s1202_s2 + $0x30] sm:$0xff] (!%p164_p2)  ;;  %v240_v13 = vld [vmem:[%s1202_s2 + $0x68] sm:$0xff] (!%p164_p2)  ;;  %v242_v15 = vld [vmem:[%s1202_s2 + $0x78] sm:$0xff] (!%p164_p2) }
   0x9   : > { %699 = vmatprep.subr.bf16.mxu0 (!%p164_p2), %v698_v3  ;;  %v732_v12 = vpack.c.bf16 (!%p164_p2), %v233_v10, %v229_v9  ;;  %731 = vmatprep.subr.bf16.mxu1 (!%p164_p2), %v730_v7  ;;  %v702_v16 = vpack.c.bf16 (!%p164_p2), %v240_v13, %v236_v11  ;;  %v734_v17 = vpack.c.bf16 (!%p164_p2), %v242_v15, %v238_v14  ;;  %v235_v18 = vld [vmem:[%s1202_s2 + $0x40] sm:$0xff] (!%p164_p2)  ;;  %v237_v20 = vld [vmem:[%s1202_s2 + $0x50] sm:$0xff] (!%p164_p2)  ;;  %v244_v23 = vld [vmem:[%s1202_s2 + $0x88] sm:$0xff] (!%p164_p2) }
   0xa   : > { %701 = vmatpush1.bf16.msra.mxu0 (!%p164_p2), %v700_v8  ;;  %v239_v19 = vld [vmem:[%s1202_s2 + $0x60] sm:$0xff] (!%p164_p2)  ;;  %v241_v22 = vld [vmem:[%s1202_s2 + $0x70] sm:$0xff] (!%p164_p2)  ;;  %v248_v24 = vld [vmem:[%s1202_s2 + $0xa8] sm:$0xff] (!%p164_p2) }
   0xb   : > { %733 = vmatpush1.bf16.msra.mxu1 (!%p164_p2), %v732_v12  ;;  %v704_v21 = vpack.c.bf16 (!%p164_p2), %v239_v19, %v235_v18  ;;  %703 = vmatprep.subr.bf16.mxu0 (!%p164_p2), %v702_v16  ;;  %v736_v25 = vpack.c.bf16 (!%p164_p2), %v241_v22, %v237_v20  ;;  %v706_v26 = vpack.c.bf16 (!%p164_p2), %v248_v24, %v244_v23  ;;  %v246_v27 = vld [vmem:[%s1202_s2 + $0x98] sm:$0xff] (!%p164_p2)  ;;  %v243_v29 = vld [vmem:[%s1202_s2 + $0x80] sm:$0xff] (!%p164_p2)  ;;  %v245_v36 = vld [vmem:[%s1202_s2 + $0x90] sm:$0xff] (!%p164_p2)  ;;  %v847_v19 = vmov (!%p164_p2), 0.0  }
   0xc   : > { %735 = vmatprep.subr.bf16.mxu1 (!%p164_p2), %v734_v17  ;;  %v250_v28 = vld [vmem:[%s1202_s2 + $0xb8] sm:$0xff] (!%p164_p2)  ;;  %v247_v33 = vld [vmem:[%s1202_s2 + $0xa0] sm:$0xff] (!%p164_p2)  ;;  %v249_v37 = vld [vmem:[%s1202_s2 + $0xb0] sm:$0xff] (!%p164_p2)  ;;  %355 = vmatprep.mubr.f32.mxu0 (!%p164_p2), %v847_v19 }
   0xd   : > { %s1206_s17 = smov (!%p190_p3, %s649_s17), 3  ;;  %v738_v32 = vpack.c.bf16 %v250_v28, %v246_v27  ;;  %v708_v35 = vpack.c.bf16 %v247_v33, %v243_v29  ;;  %v252_v38 = vld [vmem:[%s1202_s2 + $0xc8] sm:$0xff]  ;;  %v740_v39 = vpack.c.bf16 %v249_v37, %v245_v36  ;;  %v254_v41 = vld [vmem:[%s1202_s2 + $0xd8] sm:$0xff]  ;;  %v251_v46 = vld [vmem:[%s1202_s2 + $0xc0] sm:$0xff]  ;;  %432 = vmatprep.mubr.f32.mxu1 %v847_v19 }
   0xe   : > { %s650_s24 = sshll.u32 %s1206_s17, 3  ;;  %705 = vmatpush1.bf16.msra.mxu0 %v704_v21  ;;  %v256_v40 = vld [vmem:[%s1202_s2 + $0xe8] sm:$0xff]  ;;  %v258_v42 = vld [vmem:[%s1202_s2 + $0xf8] sm:$0xff]  ;;  %v255_v47 = vld [vmem:[%s1202_s2 + $0xe0] sm:$0xff] }
   0xf   : > { %s193_s7 = scalar_lea.vmem %s1200_s0, %s650_s24  ;;  %737 = vmatpush1.bf16.msra.mxu1 %v736_v25  ;;  %707 = vmatprep.subr.bf16.mxu0 %v706_v26  ;;  %v710_v44 = vpack.c.bf16 %v256_v40, %v252_v38  ;;  %v742_v45 = vpack.c.bf16 %v258_v42, %v254_v41  ;;  %v253_v48 = vld [vmem:[%s1202_s2 + $0xd0] sm:$0xff]  ;;  %v712_v49 = vpack.c.bf16 %v255_v47, %v251_v46  ;;  %v260_v52 = vld [vmem:[%s1202_s2 + $0x108] sm:$0xff]  ;;  %v262_v54 = vld [vmem:[%s1202_s2 + $0x118] sm:$0xff] }
  0x10   : > { %v952_v30 = vld [vmem:[%s193_s7] sm:$0xff]  ;;  %v954_v31 = vld [vmem:[%s193_s7 + $0x8] sm:$0xff]  ;;  %739 = vmatprep.subr.bf16.mxu1 %v738_v32  ;;  %v257_v50 = vld [vmem:[%s1202_s2 + $0xf0] sm:$0xff]  ;;  %s199_s7 = scalar_lea.vmem %s1204_s4, %s650_s24 }
  0x11   : > { %v204_v34 = vmul.f32 %v952_v30, %v952_v30  ;;  %v205_v43 = vmul.f32 %v954_v31, %v954_v31  ;;  %v744_v51 = vpack.c.bf16 %v257_v50, %v253_v48  ;;  %v264_v53 = vld [vmem:[%s1202_s2 + $0x128] sm:$0xff]  ;;  %v266_v56 = vld [vmem:[%s1202_s2 + $0x138] sm:$0xff]  ;;  %v259_v57 = vld [vmem:[%s1202_s2 + $0x100] sm:$0xff] }
  0x12   : > { %709 = vmatpush1.bf16.msra.mxu0 %v708_v35  ;;  %v714_v55 = vpack.c.bf16 %v264_v53, %v260_v52  ;;  %v263_v58 = vld [vmem:[%s1202_s2 + $0x120] sm:$0xff]  ;;  %v746_v59 = vpack.c.bf16 %v266_v56, %v262_v54  ;;  %v261_v61 = vld [vmem:[%s1202_s2 + $0x110] sm:$0xff]  ;;  %v268_v0 = vld [vmem:[%s1202_s2 + $0x148] sm:$0xff] }
  0x13   : > { %206 = vadd.xlane.f32.xlu0 %v204_v34  ;;  %741 = vmatpush1.bf16.msra.mxu1 %v740_v39  ;;  %v716_v60 = vpack.c.bf16 %v263_v58, %v259_v57  ;;  %v265_v62 = vld [vmem:[%s1202_s2 + $0x130] sm:$0xff]  ;;  %v272_v1 = vld [vmem:[%s1202_s2 + $0x168] sm:$0xff]  ;;  %v270_v2 = vld [vmem:[%s1202_s2 + $0x158] sm:$0xff] }
  0x14   : > { %711 = vmatprep.subr.bf16.mxu0 %v710_v44  ;;  %743 = vmatprep.subr.bf16.mxu1 %v742_v45  ;;  %v748_v63 = vpack.c.bf16 %v265_v62, %v261_v61  ;;  %v718_v3 = vpack.c.bf16 %v272_v1, %v268_v0  ;;  %v274_v4 = vld [vmem:[%s1202_s2 + $0x178] sm:$0xff]  ;;  %v267_v5 = vld [vmem:[%s1202_s2 + $0x140] sm:$0xff]  ;;  %v269_v9 = vld [vmem:[%s1202_s2 + $0x150] sm:$0xff] }
  0x15   : > { %v271_v6 = vld [vmem:[%s1202_s2 + $0x160] sm:$0xff]  ;;  %v750_v7 = vpack.c.bf16 %v274_v4, %v270_v2  ;;  %v273_v10 = vld [vmem:[%s1202_s2 + $0x170] sm:$0xff]  ;;  %v276_v12 = vld [vmem:[%s1202_s2 + $0x188] sm:$0xff] }
  0x16   : > { %713 = vmatpush1.bf16.msra.mxu0 %v712_v49  ;;  %v720_v8 = vpack.c.bf16 %v271_v6, %v267_v5  ;;  %v752_v11 = vpack.c.bf16 %v273_v10, %v269_v9  ;;  %v280_v13 = vld [vmem:[%s1202_s2 + $0x1a8] sm:$0xff]  ;;  %v278_v14 = vld [vmem:[%s1202_s2 + $0x198] sm:$0xff]  ;;  %v275_v17 = vld [vmem:[%s1202_s2 + $0x180] sm:$0xff] }
  0x17   : > { %208 = vadd.xlane.f32.xlu0 %v205_v43  ;;  %745 = vmatpush1.bf16.msra.mxu1 %v744_v51  ;;  %v722_v15 = vpack.c.bf16 %v280_v13, %v276_v12  ;;  %v282_v16 = vld [vmem:[%s1202_s2 + $0x1b8] sm:$0xff]  ;;  %v279_v18 = vld [vmem:[%s1202_s2 + $0x1a0] sm:$0xff]  ;;  %v277_v22 = vld [vmem:[%s1202_s2 + $0x190] sm:$0xff] }
  0x18   : > { %715 = vmatprep.subr.bf16.mxu0 %v714_v55  ;;  %747 = vmatprep.subr.bf16.mxu1 %v746_v59  ;;  %v754_v20 = vpack.c.bf16 %v282_v16, %v278_v14  ;;  %v724_v21 = vpack.c.bf16 %v279_v18, %v275_v17  ;;  %v281_v23 = vld [vmem:[%s1202_s2 + $0x1b0] sm:$0xff]  ;;  %v284_v24 = vld [vmem:[%s1202_s2 + $0x1c8] sm:$0xff]  ;;  %v286_v27 = vld [vmem:[%s1202_s2 + $0x1d8] sm:$0xff] }
  0x19   : > { %v756_v25 = vpack.c.bf16 %v281_v23, %v277_v22  ;;  %v288_v26 = vld [vmem:[%s1202_s2 + $0x1e8] sm:$0xff]  ;;  %v290_v28 = vld [vmem:[%s1202_s2 + $0x1f8] sm:$0xff]  ;;  %v283_v33 = vld [vmem:[%s1202_s2 + $0x1c0] sm:$0xff] }
  0x1a   : > { %717 = vmatpush1.bf16.msra.mxu0 %v716_v60  ;;  %v726_v29 = vpack.c.bf16 %v288_v26, %v284_v24  ;;  %v758_v32 = vpack.c.bf16 %v290_v28, %v286_v27  ;;  %v287_v34 = vld [vmem:[%s1202_s2 + $0x1e0] sm:$0xff]  ;;  %v285_v35 = vld [vmem:[%s1202_s2 + $0x1d0] sm:$0xff]  ;;  %v494_v53 = vld [vmem:[%s1203_s3 + $0x88] sm:$0xff] }
  0x1b   : > { %749 = vmatpush1.bf16.msra.mxu1 %v748_v63  ;;  %719 = vmatprep.subr.bf16.mxu0 %v718_v3  ;;  %v728_v36 = vpack.c.bf16 %v287_v34, %v283_v33  ;;  %v289_v37 = vld [vmem:[%s1202_s2 + $0x1f0] sm:$0xff]  ;;  %v653_v46 = vld [vmem:[%s1201_s1] ss:$0 sm:$0xff]  ;;  %v478_v56 = vld [vmem:[%s1203_s3 + $0x8] sm:$0xff] }
  0x1c   : > { %751 = vmatprep.subr.bf16.mxu1 %v750_v7  ;;  %v760_v38 = vpack.c.bf16 %v289_v37, %v285_v35  ;;  %v493_v52 = vld [vmem:[%s1203_s3 + $0x80] sm:$0xff]  ;;  %v495_v58 = vld [vmem:[%s1203_s3 + $0x90] sm:$0xff]  ;;  %v496_v59 = vld [vmem:[%s1203_s3 + $0x98] sm:$0xff] }
  0x1d   : > { %v762_v54 = vpack.c.bf16 %v494_v53, %v493_v52  ;;  %v477_v55 = vld [vmem:[%s1203_s3] sm:$0xff]  ;;  %v766_v60 = vpack.c.bf16 %v496_v59, %v495_v58  ;;  %v479_v61 = vld [vmem:[%s1203_s3 + $0x10] sm:$0xff]  ;;  %v480_v62 = vld [vmem:[%s1203_s3 + $0x18] sm:$0xff] }
  0x1e   : > { %721 = vmatpush1.bf16.msra.mxu0 %v720_v8  ;;  %v764_v57 = vpack.c.bf16 %v478_v56, %v477_v55  ;;  %v768_v63 = vpack.c.bf16 %v480_v62, %v479_v61  ;;  %v497_v0 = vld [vmem:[%s1203_s3 + $0xa0] sm:$0xff]  ;;  %v498_v1 = vld [vmem:[%s1203_s3 + $0xa8] sm:$0xff]  ;;  %v499_v6 = vld [vmem:[%s1203_s3 + $0xb0] sm:$0xff] }
  0x1f   : > { %753 = vmatpush1.bf16.msra.mxu1 %v752_v11  ;;  %723 = vmatprep.subr.bf16.mxu0 %v722_v15  ;;  %v770_v2 = vpack.c.bf16 %v498_v1, %v497_v0  ;;  %v481_v3 = vld [vmem:[%s1203_s3 + $0x20] sm:$0xff]  ;;  %v482_v4 = vld [vmem:[%s1203_s3 + $0x28] sm:$0xff]  ;;  %v500_v7 = vld [vmem:[%s1203_s3 + $0xb8] sm:$0xff] }
  0x20   : > { %755 = vmatprep.subr.bf16.mxu1 %v754_v20  ;;  %v772_v5 = vpack.c.bf16 %v482_v4, %v481_v3  ;;  %v774_v8 = vpack.c.bf16 %v500_v7, %v499_v6  ;;  %v483_v9 = vld [vmem:[%s1203_s3 + $0x30] sm:$0xff]  ;;  %v484_v10 = vld [vmem:[%s1203_s3 + $0x38] sm:$0xff]  ;;  %v501_v12 = vld [vmem:[%s1203_s3 + $0xc0] sm:$0xff] }
  0x21   : > { %v776_v11 = vpack.c.bf16 %v484_v10, %v483_v9  ;;  %v502_v13 = vld [vmem:[%s1203_s3 + $0xc8] sm:$0xff]  ;;  %v485_v15 = vld [vmem:[%s1203_s3 + $0x40] sm:$0xff]  ;;  %v503_v18 = vld [vmem:[%s1203_s3 + $0xd0] sm:$0xff] }
  0x22   : > { %725 = vmatpush1.bf16.msra.mxu0 %v724_v21  ;;  %v778_v14 = vpack.c.bf16 %v502_v13, %v501_v12  ;;  %v486_v16 = vld [vmem:[%s1203_s3 + $0x48] sm:$0xff]  ;;  %v487_v21 = vld [vmem:[%s1203_s3 + $0x50] sm:$0xff]  ;;  %v488_v22 = vld [vmem:[%s1203_s3 + $0x58] sm:$0xff] }
  0x23   : > { %757 = vmatpush1.bf16.msra.mxu1 %v756_v25  ;;  %727 = vmatprep.subr.bf16.mxu0 %v726_v29  ;;  %v780_v17 = vpack.c.bf16 %v486_v16, %v485_v15  ;;  %v784_v23 = vpack.c.bf16 %v488_v22, %v487_v21  ;;  %v505_v24 = vld [vmem:[%s1203_s3 + $0xe0] sm:$0xff]  ;;  %v506_v25 = vld [vmem:[%s1203_s3 + $0xe8] sm:$0xff]  ;;  %v508_v33 = vld [vmem:[%s1203_s3 + $0xf8] sm:$0xff] }
  0x24   : > { %759 = vmatprep.subr.bf16.mxu1 %v758_v32  ;;  %v786_v26 = vpack.c.bf16 %v506_v25, %v505_v24  ;;  %v489_v27 = vld [vmem:[%s1203_s3 + $0x60] sm:$0xff]  ;;  %v490_v28 = vld [vmem:[%s1203_s3 + $0x68] sm:$0xff]  ;;  %v507_v32 = vld [vmem:[%s1203_s3 + $0xf0] sm:$0xff] }
  0x25   : > { %v788_v29 = vpack.c.bf16 %v490_v28, %v489_v27  ;;  %v790_v34 = vpack.c.bf16 %v508_v33, %v507_v32  ;;  %v491_v35 = vld [vmem:[%s1203_s3 + $0x70] sm:$0xff] }
  0x26   : > { %729 = vmatpush1.bf16.msra.mxu0 %v728_v36  ;;  %v492_v36 = vld [vmem:[%s1203_s3 + $0x78] sm:$0xff] }
  0x27   : > { %761 = vmatpush1.bf16.msra.mxu1 %v760_v38  ;;  %763 = vmatprep.subr.bf16.mxu0 %v762_v54  ;;  %v792_v37 = vpack.c.bf16 %v492_v36, %v491_v35 }
  0x28   : > { %794 = vmatprep.subr.bf16.mxu1 %v762_v54 }
  0xa0   : > { %v207_v39 = vpop.xlane.xlu0 %206 }
  0xa1   : > { %v211_v40 = vmul.f32 0.0078125, %v207_v39 }
  0xa3   : > { %v213_v41 = vadd.f32 1e-05, %v211_v40 }
  0xa4   : > { %v209_v42 = vpop.xlane.xlu0 %208 }
  0xa5   : > { %819 = vrsqrt.f32 %v213_v41  ;;  %v212_v43 = vmul.f32 0.0078125, %v209_v42 }
  0xa7   : > { %v214_v44 = vadd.f32 1e-05, %v212_v43 }
  0xa9   : > { %821 = vrsqrt.f32 %v214_v44 }
  0xaf   : > { %v820_v45 = vpop.eup %819 }
  0xb0   : > { %v217_v47 = vmul.f32 %v820_v45, %v952_v30 }
  0xb2   : > { %v225_v48 = vmul.f32 %v653_v46, %v217_v47 }
  0xb3   : > { %v822_v49 = vpop.eup %821 }
  0xb4   : > { %356 = vmatmul.mubr.f32.vlgmr.msra.gmra.mrb[0].mxu0 %v225_v48  ;;  %433 = vmatmul.mubr.f32.vlgmr.msra.gmra.mrb[0].mxu1 %v225_v48  ;;  %v218_v50 = vmul.f32 %v822_v49, %v954_v31 }
  0xb5   : > { %361 = vmatprep.mubr.f32.mxu0 %v847_v19  ;;  %438 = vmatprep.mubr.f32.mxu1 %v847_v19  ;;  %v504_v19 = vld [vmem:[%s1203_s3 + $0xd8] sm:$0xff] }
  0xb6   : > { %v226_v51 = vmul.f32 %v653_v46, %v218_v50  ;;  %765 = vmatpush3.bf16.msra.mxu0 %v764_v57  ;;  %802 = vmatpush3.bf16.msra.mxu1 %v764_v57  ;;  %v782_v20 = vpack.c.bf16 %v504_v19, %v503_v18 }
  0xb7   : > { %767 = vmatprep.subr.bf16.mxu0 %v766_v60  ;;  %795 = vmatprep.subr.bf16.mxu1 %v766_v60 }
  0xb8   : > { %362 = vmatmul.mubr.f32.gmra.mrb[2].mxu0 %v226_v51  ;;  %439 = vmatmul.mubr.f32.gmra.mrb[2].mxu1 %v226_v51 }
  0xba   : > { %769 = vmatpush3.bf16.msra.mxu0 %v768_v63  ;;  %803 = vmatpush3.bf16.msra.mxu1 %v768_v63 }
  0xbb   : > { %771 = vmatprep.subr.bf16.mxu0 %v770_v2  ;;  %796 = vmatprep.subr.bf16.mxu1 %v770_v2 }
  0xbe   : > { %773 = vmatpush3.bf16.msra.mxu0 %v772_v5  ;;  %804 = vmatpush3.bf16.msra.mxu1 %v772_v5 }
  0xbf   : > { %775 = vmatprep.subr.bf16.mxu0 %v774_v8  ;;  %797 = vmatprep.subr.bf16.mxu1 %v774_v8 }
  0xc2   : > { %777 = vmatpush3.bf16.msra.mxu0 %v776_v11  ;;  %805 = vmatpush3.bf16.msra.mxu1 %v776_v11 }
  0xc3   : > { %779 = vmatprep.subr.bf16.mxu0 %v778_v14  ;;  %798 = vmatprep.subr.bf16.mxu1 %v778_v14 }
  0xc6   : > { %781 = vmatpush3.bf16.msra.mxu0 %v780_v17  ;;  %806 = vmatpush3.bf16.msra.mxu1 %v780_v17 }
  0xc7   : > { %783 = vmatprep.subr.bf16.mxu0 %v782_v20  ;;  %799 = vmatprep.subr.bf16.mxu1 %v782_v20 }
  0xca   : > { %785 = vmatpush3.bf16.msra.mxu0 %v784_v23  ;;  %807 = vmatpush3.bf16.msra.mxu1 %v784_v23 }
  0xcb   : > { %787 = vmatprep.subr.bf16.mxu0 %v786_v26  ;;  %800 = vmatprep.subr.bf16.mxu1 %v786_v26 }
  0xce   : > { %789 = vmatpush3.bf16.msra.mxu0 %v788_v29  ;;  %808 = vmatpush3.bf16.msra.mxu1 %v788_v29 }
  0xcf   : > { %791 = vmatprep.subr.bf16.mxu0 %v790_v34  ;;  %801 = vmatprep.subr.bf16.mxu1 %v790_v34 }
  0xd2   : > { %793 = vmatpush3.bf16.msra.mxu0 %v792_v37  ;;  %809 = vmatpush3.bf16.msra.mxu1 %v792_v37 }
 0x187   : > { %v357_v38 = vpop.f32.mrb[0].mxu0  ;;  %v434_v39 = vpop.f32.mrb[0].mxu1 }
 0x188   : > { %v654_v40 = vmul.f32 -1.442695, %v357_v38  ;;  %v359_v41 = vpop.f32.mrb[1].mxu0  ;;  %v436_v42 = vpop.f32.mrb[1].mxu1 }
 0x189   : > { %v655_v43 = vmul.f32 -1.442695, %v359_v41 }
 0x18a   : > { %823 = vpow2.f32 %v654_v40 }
 0x18b   : > { %825 = vpow2.f32 %v655_v43  ;;  %v363_v44 = vpop.f32.mrb[2].mxu0  ;;  %v440_v45 = vpop.f32.mrb[2].mxu1 }
 0x18c   : > { %v656_v46 = vmul.f32 -1.442695, %v363_v44  ;;  %v365_v47 = vpop.f32.mrb[3].mxu0  ;;  %v442_v48 = vpop.f32.mrb[3].mxu1 }
 0x18d   : > { %v657_v49 = vmul.f32 -1.442695, %v365_v47 }
 0x18e   : > { %827 = vpow2.f32 %v656_v46 }
 0x18f   : > { %829 = vpow2.f32 %v657_v49 }
 0x194   : > { %v824_v50 = vpop.eup %823 }
 0x195   : > { %v826_v51 = vpop.eup %825  ;;  %v457_v52 = vadd.f32 1.0, %v824_v50 }
 0x196   : > { %v458_v53 = vadd.f32 1.0, %v826_v51 }
 0x197   : > { %831 = vrcp.f32 %v457_v52 }
 0x198   : > { %v828_v54 = vpop.eup %827  ;;  %833 = vrcp.f32 %v458_v53 }
 0x199   : > { %v830_v55 = vpop.eup %829  ;;  %v459_v56 = vadd.f32 1.0, %v828_v54 }
 0x19a   : > { %v460_v57 = vadd.f32 1.0, %v830_v55 }
 0x19b   : > { %835 = vrcp.f32 %v459_v56 }
 0x19c   : > { %837 = vrcp.f32 %v460_v57 }
 0x1a1   : > { %v832_v58 = vpop.eup %831 }
 0x1a2   : > { %v834_v59 = vpop.eup %833  ;;  %v469_v60 = vmul.f32 %v832_v58, %v357_v38 }
 0x1a3   : > { %v470_v61 = vmul.f32 %v834_v59, %v359_v41 }
 0x1a4   : > { %v473_v62 = vmul.f32 %v469_v60, %v434_v39 }
 0x1a5   : > { %v836_v63 = vpop.eup %835  ;;  %v474_v0 = vmul.f32 %v470_v61, %v436_v42 }
 0x1a6   : > { %v838_v1 = vpop.eup %837  ;;  %v471_v2 = vmul.f32 %v836_v63, %v363_v44 }
 0x1a7   : > { %v472_v3 = vmul.f32 %v838_v1, %v365_v47  ;;  %573 = vmatprep.mubr.f32.mxu0 %v474_v0 }
 0x1a8   : > { %v475_v4 = vmul.f32 %v471_v2, %v440_v45  ;;  %574 = vmatmul.mubr.f32.vlgmr.msra.gmra.mrb[4].mxu0 %v473_v62 }
 0x1a9   : > { %v476_v5 = vmul.f32 %v472_v3, %v442_v48 }
 0x1ab   : > { %578 = vmatprep.mubr.f32.mxu1 %v476_v5 }
 0x1ac   : > { %579 = vmatmul.mubr.f32.vlgmr.msra.gmra.mrb[4].mxu1 %v475_v4 }
 0x27b   : > { %v692_v6 = vpop.f32.mrb[4].mxu0 }
 0x27c   : > { %v693_v7 = vpop.f32.mrb[5].mxu0 }
 0x27d   : > { %v694_v8 = vadd.f32 %v693_v7, %v692_v6 }
 0x27f   : > { %v584_v9 = vadd.f32 %v694_v8, %v952_v30  ;;  %v695_v10 = vpop.f32.mrb[4].mxu1 }
 0x280   : > { %v696_v11 = vpop.f32.mrb[5].mxu1 }
 0x281   : > { %586 = vst [vmem:[%s199_s7] sm:$0xff] %v584_v9  ;;  %v697_v12 = vadd.f32 %v696_v11, %v695_v10 }
 0x283   : > { %v585_v13 = vadd.f32 %v697_v12, %v954_v31 }
 0x285   : > { %587 = vst [vmem:[%s199_s7 + $0x8] sm:$0xff] %v585_v13 }
 0x286 PF: > { %s14_s15 = sadd.s32 1, %s845_s15  }
 0x287   : > { %p11_p4 = scmp.ge.s32.totalorder %s14_s15, 4  }
 0x289   :  { %13 = sbr.rel (!%p11_p4) target bundleno = 1 (0x1), region = 66 }

// kernel: _lambda_.5
= control target key start
LH: loop header
LB: loop body
LE: loop exit
PB: predicated region body
PF: predicated region fallthrough
CT: control target
= control target key end

     0   :  { %s2307_s24 = smov 0   ;;  %s2832_s0 = inlined_call_operand.vmem [shape: f32[2,16,128], index: 0, kind: input, shape index: {}]   ;;  %s2833_s1 = inlined_call_operand.vmem [shape: f32[1,128], index: 1, kind: input, shape index: {}]   ;;  %s2834_s2 = inlined_call_operand.vmem [shape: f32[128,384], index: 2, kind: input, shape index: {}]   ;;  %s2835_s3 = inlined_call_operand.vmem [shape: f32[128,128], index: 3, kind: input, shape index: {}]   ;;  %s2836_s4 = inlined_call_operand.vmem [shape: f32[16,32], index: 4, kind: input, shape index: {}]   ;;  %s2837_s5 = inlined_call_operand.vmem [shape: f32[16,32], index: 5, kind: input, shape index: {}]   ;;  %s2838_s6 = inlined_call_operand.vmem [shape: f32[2,1,16], index: 6, kind: input, shape index: {}]   ;;  %s2839_s7 = inlined_call_operand.vmem [shape: f32[2,16,128], index: 7, kind: output, shape index: {}]  }
   0x1 LB: > { %s1783_s25 = sadd.s32 4294967295, %s2257_s24   ;;  %p1787_p0 = scmp.ge.s32.totalorder %s2257_s24, 1  ;;  %s2257_s24 = sphi %s2307_s24, %s17_s24  }
   0x2   : > { %p245_p1 = scmp.lt.s32.totalorder %s2257_s24, 3 }
   0x4   : > { %p246_p2 = pnand %p1787_p0, %p245_p1 }
   0x5   : > { %p280_p3 = scmp.lt.s32.totalorder (!%p246_p2), %s1783_s25, 1  ;;  %v320_v0 = vld [vmem:[%s2834_s2 + $0x8] sm:$0xff] (!%p246_p2)  ;;  %v323_v1 = vld [vmem:[%s2834_s2 + $0x20] sm:$0xff] (!%p246_p2)  ;;  %v322_v4 = vld [vmem:[%s2834_s2 + $0x18] sm:$0xff] (!%p246_p2)  ;;  %v2259_v59 = vmov (!%p246_p2), 0.0   ;;  %s2260_s30 = smov (!%p246_p2), 16  }
   0x6   : > { %249 = sbr.rel (%p246_p2) target bundleno = 2820 (0xb04), region = 48  ;;  %v319_v2 = vld [vmem:[%s2834_s2] sm:$0xff] (!%p246_p2)  ;;  %v2016_v3 = vpack.c.bf16 (!%p246_p2), %v323_v1, %v320_v0  ;;  %v326_v5 = vld [vmem:[%s2834_s2 + $0x38] sm:$0xff] (!%p246_p2)  ;;  %v329_v6 = vld [vmem:[%s2834_s2 + $0x50] sm:$0xff] (!%p246_p2)  ;;  %431 = vmatprep.mubr.f32.mxu0 (!%p246_p2), %v2259_v59  ;;  %s2261_s8 = smov (!%p246_p2), 112   ;;  %vm542_vm0 = vcmask (!%p246_p2), 130048  }
   0x7   : > { %v2018_v7 = vpack.c.bf16 (!%p246_p2), %v322_v4, %v319_v2  ;;  %v2020_v8 = vpack.c.bf16 (!%p246_p2), %v329_v6, %v326_v5  ;;  %v325_v9 = vld [vmem:[%s2834_s2 + $0x30] sm:$0xff] (!%p246_p2)  ;;  %v328_v10 = vld [vmem:[%s2834_s2 + $0x48] sm:$0xff] (!%p246_p2)  ;;  %v335_v12 = vld [vmem:[%s2834_s2 + $0x80] sm:$0xff] (!%p246_p2)  ;;  %s2262_s9 = smov (!%p246_p2), 48   ;;  %s2263_s10 = smov (!%p246_p2), 80   ;;  %vm577_vm1 = vcmask (!%p246_p2), 261120  }
   0x8   : > { %v332_v11 = vld [vmem:[%s2834_s2 + $0x68] sm:$0xff] (!%p246_p2)  ;;  %2017 = vmatprep.subr.bf16.mxu0 (!%p246_p2), %v2016_v3  ;;  %v321_v13 = vld [vmem:[%s2834_s2 + $0x10] sm:$0xff] (!%p246_p2)  ;;  %v2022_v15 = vpack.c.bf16 (!%p246_p2), %v328_v10, %v325_v9  ;;  %v331_v17 = vld [vmem:[%s2834_s2 + $0x60] sm:$0xff] (!%p246_p2)  ;;  %s2264_s23 = smov (!%p246_p2), 32   ;;  %s2265_s26 = smov (!%p246_p2), 64   ;;  %vm1618_vm3 = vcmask (!%p246_p2), 523264  }
   0x9   : > { %v324_v14 = vld [vmem:[%s2834_s2 + $0x28] sm:$0xff] (!%p246_p2)  ;;  %2019 = vmatpush1.bf16.msra.mxu0 (!%p246_p2), %v2018_v7  ;;  %v334_v18 = vld [vmem:[%s2834_s2 + $0x78] sm:$0xff] (!%p246_p2)  ;;  %v2024_v19 = vpack.c.bf16 (!%p246_p2), %v335_v12, %v332_v11  ;;  %v341_v21 = vld [vmem:[%s2834_s2 + $0xb0] sm:$0xff] (!%p246_p2)  ;;  %s2266_s27 = smov (!%p246_p2), 96   ;;  %vm1621_vm4 = vcmask (!%p246_p2), 785408  }
   0xa   : > { %v2048_v16 = vpack.c.bf16 (!%p246_p2), %v324_v14, %v321_v13  ;;  %2021 = vmatprep.subr.bf16.mxu0 (!%p246_p2), %v2020_v8  ;;  %v338_v20 = vld [vmem:[%s2834_s2 + $0x98] sm:$0xff] (!%p246_p2)  ;;  %v327_v22 = vld [vmem:[%s2834_s2 + $0x40] sm:$0xff] (!%p246_p2)  ;;  %v2026_v28 = vpack.c.bf16 (!%p246_p2), %v334_v18, %v331_v17  ;;  %v337_v31 = vld [vmem:[%s2834_s2 + $0x90] sm:$0xff] (!%p246_p2) }
   0xb   : > { %v330_v25 = vld [vmem:[%s2834_s2 + $0x58] sm:$0xff] (!%p246_p2)  ;;  %v2028_v30 = vpack.c.bf16 (!%p246_p2), %v341_v21, %v338_v20  ;;  %v340_v32 = vld [vmem:[%s2834_s2 + $0xa8] sm:$0xff] (!%p246_p2)  ;;  %v347_v35 = vld [vmem:[%s2834_s2 + $0xe0] sm:$0xff] (!%p246_p2) }
   0xc   : > { %2049 = vmatprep.subr.bf16.mxu1 (!%p246_p2), %v2048_v16  ;;  %v2052_v27 = vpack.c.bf16 (!%p246_p2), %v330_v25, %v327_v22  ;;  %v2030_v33 = vpack.c.bf16 (!%p246_p2), %v340_v32, %v337_v31  ;;  %v344_v34 = vld [vmem:[%s2834_s2 + $0xc8] sm:$0xff] (!%p246_p2)  ;;  %v333_v36 = vld [vmem:[%s2834_s2 + $0x70] sm:$0xff] (!%p246_p2)  ;;  %v343_v39 = vld [vmem:[%s2834_s2 + $0xc0] sm:$0xff] (!%p246_p2) }
   0xd   : > { %s2843_s25 = smov (!%p280_p3, %s1783_s25), 1  ;;  %2051 = vmatpush3.bf16.msra.mxu1 %v2048_v16  ;;  %2023 = vmatpush1.bf16.msra.mxu0 %v2022_v15  ;;  %v2032_v37 = vpack.c.bf16 %v347_v35, %v344_v34  ;;  %v336_v38 = vld [vmem:[%s2834_s2 + $0x88] sm:$0xff]  ;;  %v346_v40 = vld [vmem:[%s2834_s2 + $0xd8] sm:$0xff]  ;;  %v353_v44 = vld [vmem:[%s2834_s2 + $0x110] sm:$0xff] }
   0xe   : > { %s1820_s29 = sshll.u32 %s2843_s25, 4  ;;  %2025 = vmatprep.subr.bf16.mxu0 %v2024_v19  ;;  %2053 = vmatprep.subr.bf16.mxu1 %v2052_v27  ;;  %v2056_v41 = vpack.c.bf16 %v336_v38, %v333_v36  ;;  %v2034_v42 = vpack.c.bf16 %v346_v40, %v343_v39  ;;  %v350_v43 = vld [vmem:[%s2834_s2 + $0xf8] sm:$0xff]  ;;  %v339_v45 = vld [vmem:[%s2834_s2 + $0xa0] sm:$0xff]  ;;  %v349_v48 = vld [vmem:[%s2834_s2 + $0xf0] sm:$0xff]  ;;  %s287_s22 = scalar_lea.vmem %s2838_s6, %s2843_s25 }
   0xf   : > { %s2365_s13 = scalar_lea.vmem %s2832_s0, %s1820_s29  ;;  %v2036_v46 = vpack.c.bf16 %v353_v44, %v350_v43  ;;  %v342_v47 = vld [vmem:[%s2834_s2 + $0xb8] sm:$0xff]  ;;  %v352_v49 = vld [vmem:[%s2834_s2 + $0x108] sm:$0xff]  ;;  %v359_v53 = vld [vmem:[%s2834_s2 + $0x140] sm:$0xff] }
  0x10   : > { %v2377_v23 = vld [vmem:[%s2365_s13] sm:$0xff]  ;;  %v2380_v24 = vld [vmem:[%s2365_s13 + $0x8] sm:$0xff]  ;;  %v2060_v50 = vpack.c.bf16 %v342_v47, %v339_v45  ;;  %v2038_v51 = vpack.c.bf16 %v352_v49, %v349_v48  ;;  %v345_v54 = vld [vmem:[%s2834_s2 + $0xd0] sm:$0xff] }
  0x11   : > { %v296_v26 = vmul.f32 %v2377_v23, %v2377_v23  ;;  %v297_v29 = vmul.f32 %v2380_v24, %v2380_v24  ;;  %2055 = vmatpush3.bf16.msra.mxu1 %v2052_v27  ;;  %2027 = vmatpush1.bf16.msra.mxu0 %v2026_v28  ;;  %v356_v52 = vld [vmem:[%s2834_s2 + $0x128] sm:$0xff]  ;;  %v355_v57 = vld [vmem:[%s2834_s2 + $0x120] sm:$0xff]  ;;  %v358_v58 = vld [vmem:[%s2834_s2 + $0x138] sm:$0xff] }
  0x12   : > { %2029 = vmatprep.subr.bf16.mxu0 %v2028_v30  ;;  %2057 = vmatprep.subr.bf16.mxu1 %v2056_v41  ;;  %v2040_v55 = vpack.c.bf16 %v359_v53, %v356_v52  ;;  %v348_v56 = vld [vmem:[%s2834_s2 + $0xe8] sm:$0xff]  ;;  %v2042_v61 = vpack.c.bf16 %v358_v58, %v355_v57  ;;  %v362_v62 = vld [vmem:[%s2834_s2 + $0x158] sm:$0xff]  ;;  %v365_v63 = vld [vmem:[%s2834_s2 + $0x170] sm:$0xff] }
  0x13   : > { %298 = vadd.xlane.f32.xlu0 %v296_v26  ;;  %v2064_v60 = vpack.c.bf16 %v348_v56, %v345_v54  ;;  %v351_v0 = vld [vmem:[%s2834_s2 + $0x100] sm:$0xff]  ;;  %v2044_v1 = vpack.c.bf16 %v365_v63, %v362_v62  ;;  %v354_v2 = vld [vmem:[%s2834_s2 + $0x118] sm:$0xff]  ;;  %v361_v3 = vld [vmem:[%s2834_s2 + $0x150] sm:$0xff] }
  0x14   : > { %v364_v4 = vld [vmem:[%s2834_s2 + $0x168] sm:$0xff]  ;;  %v2068_v5 = vpack.c.bf16 %v354_v2, %v351_v0  ;;  %v357_v7 = vld [vmem:[%s2834_s2 + $0x130] sm:$0xff]  ;;  %v363_v10 = vld [vmem:[%s2834_s2 + $0x160] sm:$0xff] }
  0x15   : > { %2031 = vmatpush1.bf16.msra.mxu0 %v2030_v33  ;;  %2059 = vmatpush3.bf16.msra.mxu1 %v2056_v41  ;;  %v2046_v6 = vpack.c.bf16 %v364_v4, %v361_v3  ;;  %v360_v8 = vld [vmem:[%s2834_s2 + $0x148] sm:$0xff]  ;;  %v366_v11 = vld [vmem:[%s2834_s2 + $0x178] sm:$0xff]  ;;  %v1792_v20 = vld [vmem:[%s2833_s1] ss:$0 sm:$0xff] }
  0x16   : > { %2033 = vmatprep.subr.bf16.mxu0 %v2032_v37  ;;  %2061 = vmatprep.subr.bf16.mxu1 %v2060_v50  ;;  %v2072_v9 = vpack.c.bf16 %v360_v8, %v357_v7  ;;  %v2076_v12 = vpack.c.bf16 %v366_v11, %v363_v10  ;;  %v2559_v44 = vld [vmem:[%s2836_s4] sm:$0xff]  ;;  %v2564_v45 = vld [vmem:[%s2836_s4 + $0x8] sm:$0xff]  ;;  %vm2581_vm2 = vmpackc.low %vm577_vm1, %vm577_vm1 }
  0x17   : > { %300 = vadd.xlane.f32.xlu0 %v297_v29 }
  0x19   : > { %2035 = vmatpush1.bf16.msra.mxu0 %v2034_v42  ;;  %2063 = vmatpush3.bf16.msra.mxu1 %v2060_v50  ;;  %v2553_v42 = vld [vmem:[%s2837_s5] sm:$0xff] }
  0x1a   : > { %2037 = vmatprep.subr.bf16.mxu0 %v2036_v46  ;;  %2065 = vmatprep.subr.bf16.mxu1 %v2064_v60  ;;  %v2569_v46 = vld [vmem:[%s2837_s5 + $0x8] sm:$0xff] }
  0x1d   : > { %2039 = vmatpush1.bf16.msra.mxu0 %v2038_v51  ;;  %2067 = vmatpush3.bf16.msra.mxu1 %v2064_v60 }
  0x1e   : > { %2041 = vmatprep.subr.bf16.mxu0 %v2040_v55  ;;  %2069 = vmatprep.subr.bf16.mxu1 %v2068_v5 }
  0x21   : > { %2043 = vmatpush1.bf16.msra.mxu0 %v2042_v61  ;;  %2071 = vmatpush3.bf16.msra.mxu1 %v2068_v5  ;;  %v2602_v5 = vld [vmem:[%s287_s22] ss:$0 sm:$0xff]  ;;  %s292_s22 = scalar_lea.vmem %s2839_s7, %s1820_s29 }
  0x22   : > { %2045 = vmatprep.subr.bf16.mxu0 %v2044_v1  ;;  %2073 = vmatprep.subr.bf16.mxu1 %v2072_v9 }
  0x25   : > { %2047 = vmatpush1.bf16.msra.mxu0 %v2046_v6  ;;  %2075 = vmatpush3.bf16.msra.mxu1 %v2072_v9 }
  0x26   : > { %2077 = vmatprep.subr.bf16.mxu1 %v2076_v12 }
  0x29   : > { %2079 = vmatpush3.bf16.msra.mxu1 %v2076_v12 }
  0xa0   : > { %v299_v13 = vpop.xlane.xlu0 %298 }
  0xa1   : > { %v303_v14 = vmul.f32 0.0078125, %v299_v13 }
  0xa3   : > { %v305_v15 = vadd.f32 1e-05, %v303_v14 }
  0xa4   : > { %v301_v16 = vpop.xlane.xlu0 %300 }
  0xa5   : > { %2213 = vrsqrt.f32 %v305_v15  ;;  %v304_v17 = vmul.f32 0.0078125, %v301_v16 }
  0xa7   : > { %v306_v18 = vadd.f32 1e-05, %v304_v17 }
  0xa9   : > { %2215 = vrsqrt.f32 %v306_v18 }
  0xaf   : > { %v2214_v19 = vpop.eup %2213 }
  0xb0   : > { %v309_v21 = vmul.f32 %v2214_v19, %v2377_v23 }
  0xb2   : > { %v317_v22 = vmul.f32 %v1792_v20, %v309_v21 }
  0xb3   : > { %v2216_v25 = vpop.eup %2215 }
  0xb4   : > { %432 = vmatmul.mubr.f32.vlgmr.msra.gmra.mrb[0].mxu0 %v317_v22  ;;  %1922 = vmatprep.mubr.f32.mxu1 %v317_v22  ;;  %v310_v26 = vmul.f32 %v2216_v25, %v2380_v24 }
  0xb5   : > { %437 = vmatprep.mubr.f32.mxu0 %v2259_v59 }
  0xb6   : > { %v318_v27 = vmul.f32 %v1792_v20, %v310_v26 }
  0xb8   : > { %438 = vmatmul.mubr.f32.gmra.mrb[2].mxu0 %v318_v27  ;;  %1923 = vmatmul.mubr.f32.vlgmr.msra.gmra.mrb[0].mxu1 %v318_v27 }
 0x187   : > { %v2484_v28 = vpop.f32.mrb[0].mxu0 }
 0x188   : > { %v2486_v29 = vpop.f32.mrb[1].mxu0  ;;  %v2489_v30 = vsub.f32 0.0, %v2484_v28  ;;  %v545_v59 = vmul.f32 %v2559_v44, %v2484_v28 }
 0x189   : > { %563 = vrot.lane.b32.xlu0 %v2486_v29, %s2260_s30  ;;  %v2500_v32 = vsub.f32 0.0, %v2486_v29  ;;  %v571_v50 = vmul.f32 %v2559_v44, %v2486_v29 }
 0x18a   : > { %528 = vrot.lane.b32.xlu1 %v2489_v30, %s2261_s8 }
 0x18b   : > { %v2495_v23 = vpop.f32.mrb[2].mxu0  ;;  %v1924_v24 = vpop.f32.mrb[0].mxu1 }
 0x18c   : > { %v2497_v31 = vpop.f32.mrb[3].mxu0  ;;  %v510_v33 = vpop.f32.mrb[1].mxu1  ;;  %v2524_v37 = vsub.f32 0.0, %v2495_v23  ;;  %v546_v1 = vmul.f32 %v2564_v45, %v2495_v23 }
 0x18d   : > { %822 = vrot.lane.b32.xlu0 %v2497_v31, %s2261_s8  ;;  %v2086_v34 = vpack.c.bf16 %v1924_v24, %v510_v33  ;;  %v2504_v35 = vpack.i.bf16 %v1924_v24, %v510_v33  ;;  %v2513_v36 = vsub.f32 0.0, %v2497_v31  ;;  %v572_v51 = vmul.f32 %v2564_v45, %v2497_v31 }
 0x18e   : > { %555 = vrot.lane.b32.xlu1 %v2500_v32, %s2261_s8 }
 0x191   : > { %1086 = vrot.lane.b32.xlu0 %v2500_v32, %s2262_s9 }
 0x192   : > { %565 = vrot.lane.b32.xlu1 %v2497_v31, %s2260_s30 }
 0x195   : > { %1092 = vrot.lane.b32.xlu0 %v2486_v29, %s2263_s10 }
 0x196   : > { %557 = vrot.lane.b32.xlu1 %v2513_v36, %s2261_s8 }
 0x199   : > { %1094 = vrot.lane.b32.xlu0 %v2497_v31, %s2263_s10 }
 0x19a   : > { %536 = vrot.lane.b32.xlu1 %v2484_v28, %s2260_s30 }
 0x19d   : > { %784 = vrot.lane.b32.xlu0 %v2484_v28, %s2261_s8 }
 0x19e   : > { %530 = vrot.lane.b32.xlu1 %v2524_v37, %s2261_s8 }
 0x1a1   : > { %816 = vrot.lane.b32.xlu0 %v2513_v36, %s2263_s10 }
 0x1a2   : > { %538 = vrot.lane.b32.xlu1 %v2495_v23, %s2260_s30 }
 0x1a5   : > { %1088 = vrot.lane.b32.xlu0 %v2513_v36, %s2262_s9 }
 0x1a6   : > { %814 = vrot.lane.b32.xlu1 %v2500_v32, %s2263_s10 }
 0x1aa   : > { %820 = vrot.lane.b32.xlu1 %v2486_v29, %s2261_s8 }
 0x1ae   : > { %778 = vrot.lane.b32.xlu1 %v2489_v30, %s2263_s10 }
 0x1b2   : > { %780 = vrot.lane.b32.xlu1 %v2524_v37, %s2263_s10 }
 0x1b6   : > { %786 = vrot.lane.b32.xlu1 %v2495_v23, %s2261_s8 }
 0x1ba   : > { %1052 = vrot.lane.b32.xlu1 %v2489_v30, %s2262_s9 }
 0x1be   : > { %1058 = vrot.lane.b32.xlu1 %v2484_v28, %s2263_s10 }
 0x1fb   : > { %v564_v40 = vpop.permute.xlu0 %563 }
 0x1fc   : > { %v529_v38 = vpop.permute.xlu1 %528 }
 0x1ff   : > { %v823_v4 = vpop.permute.xlu0 %822 }
 0x200   : > { %v556_v39 = vpop.permute.xlu1 %555 }
 0x201   : > { %v569_v43 = vsel %vm542_vm0, %v556_v39, %v564_v40 }
 0x202   : > { %v573_v47 = vmul.f32 %v569_v43, %v2553_v42 }
 0x203   : > { %v1087_v11 = vpop.permute.xlu0 %1086 }
 0x204   : > { %v566_v41 = vpop.permute.xlu1 %565  ;;  %v575_v53 = vadd.f32 %v573_v47, %v571_v50 }
 0x207   : > { %v1093_v16 = vpop.permute.xlu0 %1092 }
 0x208   : > { %v558_v48 = vpop.permute.xlu1 %557 }
 0x209   : > { %v570_v49 = vsel %vm542_vm0, %v558_v48, %v566_v41 }
 0x20a   : > { %v574_v52 = vmul.f32 %v570_v49, %v2569_v46 }
 0x20b   : > { %v1095_v18 = vpop.permute.xlu0 %1094 }
 0x20c   : > { %v576_v54 = vadd.f32 %v574_v52, %v572_v51  ;;  %v537_v55 = vpop.permute.xlu1 %536 }
 0x20d   : > { %v543_v56 = vsel %vm542_vm0, %v529_v38, %v537_v55  ;;  %v1098_v38 = vsel %vm542_vm0, %v1087_v11, %v1093_v16 }
 0x20e   : > { %v2080_v58 = vpack.c.bf16 %v576_v54, %v575_v53  ;;  %v547_v60 = vmul.f32 %v543_v56, %v2553_v42  ;;  %v1102_v40 = vmul.f32 %v1098_v38, %v2553_v42 }
 0x20f   : > { %v785_v20 = vpop.permute.xlu0 %784 }
 0x210   : > { %v549_v61 = vadd.f32 %v547_v60, %v545_v59  ;;  %v531_v62 = vpop.permute.xlu1 %530  ;;  %2082 = vmatprep.subr.msk.bf16.mxu1 %vm2581_vm2, %v2080_v58 }
 0x211   : > { %2085 = vmatpush3.bf16.xpose.msk.msra.mxu1 %vm2581_vm2, %v2080_v58 }
 0x212   : > { %1929 = vmatprep.mubr.msk.f32.mxu1 %vm577_vm1, %v549_v61  ;;  %2087 = vmatprep.subr.bf16.mxu1 %v2086_v34 }
 0x213   : > { %v817_v25 = vpop.permute.xlu0 %816 }
 0x214   : > { %v539_v63 = vpop.permute.xlu1 %538  ;;  %v827_v24 = vsel %vm542_vm0, %v817_v25, %v823_v4 }
 0x215   : > { %v544_v0 = vsel %vm542_vm0, %v531_v62, %v539_v63  ;;  %v831_v33 = vmul.f32 %v827_v24, %v2569_v46 }
 0x216   : > { %v548_v2 = vmul.f32 %v544_v0, %v2569_v46 }
 0x217   : > { %v1089_v39 = vpop.permute.xlu0 %1088 }
 0x218   : > { %v550_v3 = vadd.f32 %v548_v2, %v546_v1  ;;  %v815_v12 = vpop.permute.xlu1 %814  ;;  %v1099_v41 = vsel %vm542_vm0, %v1089_v39, %v1095_v18 }
 0x219   : > { %v1103_v48 = vmul.f32 %v1099_v41, %v2569_v46 }
 0x21a   : > { %1930 = vmatmul.mubr.msk.f32.vlgmr.msra.gmra.mrb[2].mxu1 %vm577_vm1, %v550_v3 }
 0x21b   : > { %2089 = vmatpush3.bf16.msra.mxu1 %v2086_v34 }
 0x21c   : > { %v821_v17 = vpop.permute.xlu1 %820 }
 0x21d   : > { %v826_v22 = vsel %vm542_vm0, %v815_v12, %v821_v17 }
 0x21e   : > { %v830_v27 = vmul.f32 %v826_v22, %v2553_v42 }
 0x220   : > { %v779_v19 = vpop.permute.xlu1 %778 }
 0x221   : > { %v790_v43 = vsel %vm542_vm0, %v779_v19, %v785_v20 }
 0x222   : > { %v802_v49 = vmul.f32 %v790_v43, %v2553_v42 }
 0x224   : > { %v781_v21 = vpop.permute.xlu1 %780 }
 0x228   : > { %v787_v26 = vpop.permute.xlu1 %786 }
 0x229   : > { %v791_v50 = vsel %vm542_vm0, %v781_v21, %v787_v26 }
 0x22a   : > { %v803_v52 = vmul.f32 %v791_v50, %v2569_v46 }
 0x22c   : > { %v1053_v34 = vpop.permute.xlu1 %1052 }
 0x230   : > { %v1059_v47 = vpop.permute.xlu1 %1058 }
 0x231   : > { %v1064_v51 = vsel %vm542_vm0, %v1053_v34, %v1059_v47 }
 0x232   : > { %v1074_v53 = vmul.f32 %v1064_v51, %v2553_v42 }
 0x2ed   : > { %v1931_v6 = vpop.f32.mrb[2].mxu1 }
 0x2ee   : > { %v666_v7 = vmul.f32 0.17677669, %v1931_v6  ;;  %v656_v8 = vpop.f32.mrb[3].mxu1 }
 0x2ef   : > { %v665_v9 = vmul.f32 0.17677669, %v656_v8 }
 0x2f0   : > { %v2605_v10 = vadd.f32 %v2602_v5, %v666_v7 }
 0x2f1   : > { %v2608_v13 = vadd.f32 %v2602_v5, %v665_v9 }
 0x2f2   : > { %v678_v14 = vsel %vm542_vm0, %v2605_v10, -inf }
 0x2f3   : > { %679 = vmax.xlane.f32.xlu0 %v678_v14  ;;  %v675_v15 = vsel %vm542_vm0, %v2608_v13, -inf }
 0x2f4   : > { %676 = vmax.xlane.f32.xlu1 %v675_v15 }
 0x305   : > { %1054 = vrot.lane.b32.xlu1 %v2524_v37, %s2262_s9 }
 0x309   : > { %1060 = vrot.lane.b32.xlu0 %v2495_v23, %s2263_s10  ;;  %794 = vrot.lane.b32.xlu1 %v2559_v44, %s2264_s23 }
 0x30d   : > { %796 = vrot.lane.b32.xlu0 %v2564_v45, %s2264_s23  ;;  %834 = vrot.lane.b32.xlu1 %v830_v27, %s2264_s23 }
 0x311   : > { %1066 = vrot.lane.b32.xlu1 %v2559_v44, %s2265_s26  ;;  %836 = vrot.lane.b32.xlu0 %v831_v33, %s2264_s23 }
 0x315   : > { %1106 = vrot.lane.b32.xlu1 %v1102_v40, %s2265_s26  ;;  %1068 = vrot.lane.b32.xlu0 %v2564_v45, %s2265_s26 }
 0x319   : > { %806 = vrot.lane.b32.xlu1 %v802_v49, %s2264_s23  ;;  %1108 = vrot.lane.b32.xlu0 %v1103_v48, %s2265_s26 }
 0x31d   : > { %1078 = vrot.lane.b32.xlu1 %v1074_v53, %s2265_s26  ;;  %808 = vrot.lane.b32.xlu0 %v803_v52, %s2264_s23 }
 0x380   : > { %v680_v54 = vpop.xlane.xlu0 %679 }
 0x381   : > { %v677_v55 = vpop.xlane.xlu1 %676  ;;  %v682_v12 = vsub.f32 %v2605_v10, %v680_v54 }
 0x382   : > { %v681_v26 = vsub.f32 %v2608_v13, %v677_v55 }
 0x383   : > { %v685_v19 = vmul.f32 1.442695, %v682_v12 }
 0x384   : > { %v1061_v56 = vpop.permute.xlu0 %1060  ;;  %v683_v10 = vmul.f32 1.442695, %v681_v26 }
 0x385   : > { %v1055_v58 = vpop.permute.xlu1 %1054  ;;  %2217 = vpow2.f32 %v685_v19 }
 0x386   : > { %v1065_v59 = vsel %vm542_vm0, %v1055_v58, %v1061_v56  ;;  %2219 = vpow2.f32 %v683_v10 }
 0x387   : > { %v1075_v60 = vmul.f32 %v1065_v59, %v2569_v46 }
 0x388   : > { %v797_v61 = vpop.permute.xlu0 %796 }
 0x389   : > { %v795_v62 = vpop.permute.xlu1 %794  ;;  %1080 = vrot.lane.b32.xlu0 %v1075_v60, %s2265_s26  ;;  %v829_v0 = vmul.f32 %v797_v61, %v2497_v31  ;;  %v801_v34 = vmul.f32 %v797_v61, %v2495_v23 }
 0x38a   : > { %v800_v63 = vmul.f32 %v795_v62, %v2484_v28  ;;  %v828_v1 = vmul.f32 %v795_v62, %v2486_v29 }
 0x38c   : > { %v837_v2 = vpop.permute.xlu0 %836 }
 0x38d   : > { %v841_v3 = vadd.f32 %v837_v2, %v829_v0  ;;  %v835_v4 = vpop.permute.xlu1 %834 }
 0x38e   : > { %v840_v6 = vadd.f32 %v835_v4, %v828_v1 }
 0x38f   : > { %v2218_v22 = vpop.eup %2217 }
 0x390   : > { %v2168_v7 = vpack.i.bf16 %v841_v3, %v840_v6  ;;  %v1069_v8 = vpop.permute.xlu0 %1068  ;;  %v690_v25 = vsel %vm542_vm0, %v2218_v22, 0.0  ;;  %v2220_v27 = vpop.eup %2219 }
 0x391   : > { %v1073_v9 = vmul.f32 %v1069_v8, %v2495_v23  ;;  %v1067_v11 = vpop.permute.xlu1 %1066  ;;  %v1101_v14 = vmul.f32 %v1069_v8, %v2497_v31  ;;  %v687_v33 = vsel %vm542_vm0, %v2220_v27, 0.0 }
 0x392   : > { %v1100_v15 = vmul.f32 %v1067_v11, %v2486_v29  ;;  %v1072_v13 = vmul.f32 %v1067_v11, %v2484_v28 }
 0x394   : > { %v1109_v16 = vpop.permute.xlu0 %1108 }
 0x395   : > { %v1113_v17 = vadd.f32 %v1109_v16, %v1101_v14  ;;  %v1107_v18 = vpop.permute.xlu1 %1106 }
 0x396   : > { %v1112_v20 = vadd.f32 %v1107_v18, %v1100_v15 }
 0x398   : > { %v2173_v21 = vpack.i.bf16 %v1113_v17, %v1112_v20  ;;  %v809_v24 = vpop.permute.xlu0 %808 }
 0x399   : > { %v813_v38 = vadd.f32 %v809_v24, %v801_v34  ;;  %v807_v39 = vpop.permute.xlu1 %806 }
 0x39a   : > { %2174 = vrot.lane.b32.xlu1 %v2173_v21, %s2265_s26  ;;  %v812_v40 = vadd.f32 %v807_v39, %v800_v63 }
 0x39d   : > { %v1079_v41 = vpop.permute.xlu1 %1078 }
 0x39e   : > { %v1084_v43 = vadd.f32 %v1079_v41, %v1072_v13 }
 0x3a8   : > { %691 = vadd.xlane.f32.xlu0 %v690_v25 }
 0x3be   : > { %2169 = vrot.lane.b32.xlu0 %v2168_v7, %s2266_s27  ;;  %688 = vadd.xlane.f32.xlu1 %v687_v33 }
 0x3c2   : > { %846 = vrot.lane.b32.xlu0 %v813_v38, %s2266_s27 }
 0x3cf   : > { %844 = vrot.lane.b32.xlu1 %v812_v40, %s2266_s27 }
 0x3d3   : > { %1116 = vrot.lane.b32.xlu1 %v1084_v43, %s2265_s26 }
 0x3d7   : > { %1356 = vrot.lane.b32.xlu1 %v2500_v32, %s2260_s30 }
 0x3db   : > { %1362 = vrot.lane.b32.xlu1 %v2486_v29, %s2262_s9 }
 0x3df   : > { %1328 = vrot.lane.b32.xlu1 %v2484_v28, %s2262_s9 }
 0x3fb   : > { %v1081_v47 = vpop.permute.xlu0 %1080 }
 0x3fc   : > { %v1085_v48 = vadd.f32 %v1081_v47, %v1073_v9 }
 0x3fe   : > { %1118 = vrot.lane.b32.xlu0 %v1085_v48, %s2265_s26 }
 0x402   : > { %1358 = vrot.lane.b32.xlu0 %v2513_v36, %s2260_s30 }
 0x406   : > { %1364 = vrot.lane.b32.xlu0 %v2497_v31, %s2262_s9 }
 0x40a   : > { %1322 = vrot.lane.b32.xlu0 %v2489_v30, %s2260_s30 }
 0x40c   : > { %v2175_v53 = vpop.permute.xlu1 %2174 }
 0x40d   : > { %v2177_v56 = vunpack.i.h.bf16 %v2175_v53  ;;  %v2176_v58 = vunpack.i.l.bf16 %v2175_v53 }
 0x40f   : > { %v2100_v30 = vpack.c.bf16 %v2177_v56, %v2176_v58 }
 0x435   : > { %v692_v32 = vpop.xlane.xlu0 %691 }
 0x436   : > { %2221 = vrcp.f32 %v692_v32 }
 0x439   : > { %v2170_v49 = vpop.permute.xlu0 %2169 }
 0x43a   : > { %v2172_v50 = vunpack.i.h.bf16 %v2170_v49  ;;  %v2171_v51 = vunpack.i.l.bf16 %v2170_v49 }
 0x43c   : > { %v2090_v52 = vpack.c.bf16 %v2172_v50, %v2171_v51 }
 0x43d   : > { %v847_v62 = vpop.permute.xlu0 %846 }
 0x43e   : > { %2092 = vmatprep.subr.msk.bf16.mxu1 %vm2581_vm2, %v2090_v52 }
 0x440   : > { %v2222_v55 = vpop.eup %2221 }
 0x441   : > { %v696_v60 = vmul.f32 %v2222_v55, %v2218_v22 }
 0x44b   : > { %v689_v54 = vpop.xlane.xlu1 %688 }
 0x44c   : > { %2223 = vrcp.f32 %v689_v54 }
 0x44f   : > { %v845_v61 = vpop.permute.xlu1 %844 }
 0x453   : > { %v1117_v63 = vpop.permute.xlu1 %1116 }
 0x456   : > { %v2224_v36 = vpop.eup %2223 }
 0x457   : > { %v694_v59 = vmul.f32 %v2224_v36, %v2220_v27  ;;  %v1357_v17 = vpop.permute.xlu1 %1356 }
 0x459   : > { %1936 = vmatprep.mubr.msk.f32.mxu1 %vm542_vm0, %v694_v59 }
 0x45a   : > { %1937 = vmatmul.mubr.msk.f32.vlgmr.msra.gmra.mrb[4].mxu1 %vm542_vm0, %v696_v60 }
 0x45b   : > { %2095 = vmatpush3.bf16.xpose.msk.msra.mxu1 %vm2581_vm2, %v2090_v52  ;;  %1943 = vmatprep.mubr.msk.f32.mxu1 %vm577_vm1, %v845_v61  ;;  %v1363_v19 = vpop.permute.xlu1 %1362 }
 0x45c   : > { %2102 = vmatprep.subr.msk.bf16.mxu1 %vm2581_vm2, %v2100_v30  ;;  %v1368_v20 = vsel %vm542_vm0, %v1357_v17, %v1363_v19 }
 0x45d   : > { %v1372_v22 = vmul.f32 %v1368_v20, %v2553_v42 }
 0x45f   : > { %v1329_v25 = vpop.permute.xlu1 %1328 }
 0x462   : > { %1944 = vmatmul.mubr.msk.f32.vlgmr.msra.gmra.mrb[6].mxu1 %vm577_vm1, %v847_v62 }
 0x463   : > { %2105 = vmatpush3.bf16.xpose.msk.msra.mxu1 %vm2581_vm2, %v2100_v30  ;;  %1957 = vmatprep.mubr.msk.f32.mxu1 %vm577_vm1, %v1117_v63 }
 0x470   : > { %v1119_v0 = vpop.permute.xlu0 %1118 }
 0x471   : > { %1958 = vmatmul.mubr.msk.f32.vlgmr.msra.gmra.mrb[8].mxu1 %vm577_vm1, %v1119_v0 }
 0x474   : > { %v1359_v16 = vpop.permute.xlu0 %1358 }
 0x478   : > { %v1365_v18 = vpop.permute.xlu0 %1364 }
 0x479   : > { %v1369_v26 = vsel %vm542_vm0, %v1359_v16, %v1365_v18 }
 0x47c   : > { %v1323_v21 = vpop.permute.xlu0 %1322 }
 0x47d   : > { %v1334_v10 = vsel %vm542_vm0, %v1323_v21, %v1329_v25 }
 0x47e   : > { %v1344_v27 = vmul.f32 %v1334_v10, %v2553_v42 }
 0x52d   : > { %v2694_v1 = vpop.f32.mrb[4].mxu1 }
 0x52e   : > { %v2696_v2 = vpop.f32.mrb[5].mxu1 }
 0x535   : > { %v2698_v3 = vpop.f32.mrb[6].mxu1 }
 0x536   : > { %v2700_v4 = vpop.f32.mrb[7].mxu1  ;;  %v938_v61 = vmul.f32 0.17677669, %v2698_v3 }
 0x537   : > { %v937_v56 = vmul.f32 0.17677669, %v2700_v4 }
 0x538   : > { %v940_v62 = vadd.f32 %v2602_v5, %v938_v61 }
 0x539   : > { %v939_v58 = vadd.f32 %v2602_v5, %v937_v56 }
 0x53b   : > { %v941_v59 = vsel %vm542_vm0, %v939_v58, -inf }
 0x544   : > { %v1959_v6 = vpop.f32.mrb[8].mxu1 }
 0x545   : > { %v1210_v7 = vmul.f32 0.17677669, %v1959_v6  ;;  %v1200_v8 = vpop.f32.mrb[9].mxu1 }
 0x546   : > { %v1209_v9 = vmul.f32 0.17677669, %v1200_v8 }
 0x547   : > { %v1212_v11 = vadd.f32 %v2602_v5, %v1210_v7 }
 0x548   : > { %v1211_v12 = vadd.f32 %v2602_v5, %v1209_v9 }
 0x549   : > { %v1216_v14 = vsel %vm542_vm0, %v1212_v11, -inf }
 0x54a   : > { %1217 = vmax.xlane.f32.xlu0 %v1216_v14  ;;  %v1213_v15 = vsel %vm542_vm0, %v1211_v12, -inf }
 0x54b   : > { %1214 = vmax.xlane.f32.xlu1 %v1213_v15 }
 0x55c   : > { %1324 = vrot.lane.b32.xlu1 %v2524_v37, %s2260_s30  ;;  %v1373_v37 = vmul.f32 %v1369_v26, %v2569_v46 }
 0x560   : > { %1330 = vrot.lane.b32.xlu0 %v2495_v23, %s2262_s9  ;;  %1336 = vrot.lane.b32.xlu1 %v2559_v44, %s2266_s27 }
 0x564   : > { %1338 = vrot.lane.b32.xlu0 %v2564_v45, %s2266_s27  ;;  %1376 = vrot.lane.b32.xlu1 %v1372_v22, %s2266_s27 }
 0x568   : > { %1378 = vrot.lane.b32.xlu0 %v1373_v37, %s2266_s27  ;;  %1348 = vrot.lane.b32.xlu1 %v1344_v27, %s2266_s27 }
 0x5d7   : > { %v1218_v44 = vpop.xlane.xlu0 %1217 }
 0x5d8   : > { %v1215_v24 = vpop.xlane.xlu1 %1214  ;;  %v1220_v50 = vsub.f32 %v1212_v11, %v1218_v44 }
 0x5da   : > { %v1223_v51 = vmul.f32 1.442695, %v1220_v50 }
 0x5db   : > { %v1331_v33 = vpop.permute.xlu0 %1330 }
 0x5dc   : > { %v1325_v34 = vpop.permute.xlu1 %1324  ;;  %2225 = vpow2.f32 %v1223_v51 }
 0x5dd   : > { %v1335_v38 = vsel %vm542_vm0, %v1325_v34, %v1331_v33 }
 0x5de   : > { %v1345_v39 = vmul.f32 %v1335_v38, %v2569_v46  ;;  %v1219_v46 = vsub.f32 %v1211_v12, %v1215_v24 }
 0x5df   : > { %v1339_v40 = vpop.permute.xlu0 %1338 }
 0x5e0   : > { %v1343_v45 = vmul.f32 %v1339_v40, %v2495_v23  ;;  %1350 = vrot.lane.b32.xlu0 %v1345_v39, %s2266_s27  ;;  %v1337_v41 = vpop.permute.xlu1 %1336  ;;  %v1371_v42 = vmul.f32 %v1339_v40, %v2497_v31  ;;  %v1221_v23 = vmul.f32 1.442695, %v1219_v46 }
 0x5e1   : > { %v1370_v13 = vmul.f32 %v1337_v41, %v2486_v29  ;;  %v1342_v55 = vmul.f32 %v1337_v41, %v2484_v28  ;;  %v944_v28 = vsel %vm542_vm0, %v940_v62, -inf }
 0x5e2   : > { %2227 = vpow2.f32 %v1221_v23 }
 0x5e3   : > { %v1379_v43 = vpop.permute.xlu0 %1378 }
 0x5e4   : > { %v1383_v47 = vadd.f32 %v1379_v43, %v1371_v42  ;;  %v1377_v48 = vpop.permute.xlu1 %1376 }
 0x5e5   : > { %v1382_v32 = vadd.f32 %v1377_v48, %v1370_v13 }
 0x5e6   : > { %v2226_v52 = vpop.eup %2225 }
 0x5e7   : > { %v2183_v49 = vpack.i.bf16 %v1383_v47, %v1382_v32  ;;  %v1228_v53 = vsel %vm542_vm0, %v2226_v52, 0.0 }
 0x5e8   : > { %v1349_v54 = vpop.permute.xlu1 %1348 }
 0x5e9   : > { %2184 = vrot.lane.b32.xlu1 %v2183_v49, %s2264_s23  ;;  %v1354_v36 = vadd.f32 %v1349_v54, %v1342_v55 }
 0x5ec   : > { %v2228_v31 = vpop.eup %2227 }
 0x5ed   : > { %v1225_v29 = vsel %vm542_vm0, %v2228_v31, 0.0 }
 0x5ff   : > { %1229 = vadd.xlane.f32.xlu0 %v1228_v53 }
 0x60d   : > { %1226 = vadd.xlane.f32.xlu1 %v1225_v29 }
 0x615   : > { %2179 = vrot.lane.b32.xlu0 %v2504_v35, %s2265_s26 }
 0x61e   : > { %1386 = vrot.lane.b32.xlu1 %v1354_v36, %s2264_s23 }
 0x642   : > { %942 = vmax.xlane.f32.xlu1 %v941_v59 }
 0x652   : > { %v1351_v60 = vpop.permute.xlu0 %1350 }
 0x653   : > { %v1355_v30 = vadd.f32 %v1351_v60, %v1343_v45 }
 0x655   : > { %1388 = vrot.lane.b32.xlu0 %v1355_v30, %s2264_s23 }
 0x65b   : > { %v2185_v0 = vpop.permute.xlu1 %2184 }
 0x65c   : > { %v2187_v4 = vunpack.i.h.bf16 %v2185_v0  ;;  %v2186_v7 = vunpack.i.l.bf16 %v2185_v0 }
 0x65e   : > { %v2110_v12 = vpack.c.bf16 %v2187_v4, %v2186_v7 }
 0x674   : > { %945 = vmax.xlane.f32.xlu0 %v944_v28 }
 0x68c   : > { %v1230_v63 = vpop.xlane.xlu0 %1229 }
 0x68d   : > { %2229 = vrcp.f32 %v1230_v63 }
 0x690   : > { %v2180_v6 = vpop.permute.xlu0 %2179 }
 0x691   : > { %v2182_v8 = vunpack.i.h.bf16 %v2180_v6  ;;  %v2181_v9 = vunpack.i.l.bf16 %v2180_v6 }
 0x693   : > { %v2106_v11 = vpack.c.bf16 %v2182_v8, %v2181_v9  ;;  %v1624_v8 = vld [vmem:[%s2835_s3] sm:$0xff]  ;;  %v1625_v9 = vld [vmem:[%s2835_s3 + $0x8] sm:$0xff] }
 0x695   : > { %2107 = vmatprep.subr.bf16.mxu1 %v2106_v11 }
 0x696   : > { %2109 = vmatpush3.bf16.msra.mxu1 %v2106_v11  ;;  %v1626_v11 = vld [vmem:[%s2835_s3 + $0x10] sm:$0xff] }
 0x697   : > { %2112 = vmatprep.subr.msk.bf16.mxu1 %vm2581_vm2, %v2110_v12  ;;  %v2230_v14 = vpop.eup %2229 }
 0x698   : > { %v1234_v17 = vmul.f32 %v2230_v14, %v2226_v52 }
 0x69a   : > { %v1227_v3 = vpop.xlane.xlu1 %1226 }
 0x69b   : > { %2231 = vrcp.f32 %v1227_v3  ;;  %v1627_v3 = vld [vmem:[%s2835_s3 + $0x18] sm:$0xff] }
 0x69c   : > { %v2124_v14 = vpack.c.bf16 %v1627_v3, %v1626_v11 }
 0x69e   : > { %v1387_v18 = vpop.permute.xlu1 %1386 }
 0x6a5   : > { %v2232_v15 = vpop.eup %2231 }
 0x6a6   : > { %v1232_v16 = vmul.f32 %v2232_v15, %v2228_v31  ;;  %v1628_v15 = vld [vmem:[%s2835_s3 + $0x20] sm:$0xff] }
 0x6a8   : > { %1964 = vmatprep.mubr.msk.f32.mxu1 %vm542_vm0, %v1232_v16  ;;  %v1629_v16 = vld [vmem:[%s2835_s3 + $0x28] sm:$0xff] }
 0x6a9   : > { %1965 = vmatmul.mubr.msk.f32.vlgmr.msra.gmra.mrb[10].mxu1 %vm542_vm0, %v1234_v17  ;;  %v2128_v17 = vpack.c.bf16 %v1629_v16, %v1628_v15 }
 0x6aa   : > { %2115 = vmatpush3.bf16.xpose.msk.msra.mxu1 %vm2581_vm2, %v2110_v12  ;;  %1971 = vmatprep.mubr.msk.f32.mxu1 %vm577_vm1, %v1387_v18  ;;  %v2120_v12 = vpack.c.bf16 %v1625_v9, %v1624_v8  ;;  %v1630_v18 = vld [vmem:[%s2835_s3 + $0x30] sm:$0xff] }
 0x6c7   : > { %v1389_v19 = vpop.permute.xlu0 %1388 }
 0x6c8   : > { %1972 = vmatmul.mubr.msk.f32.vlgmr.msra.gmra.mrb[12].mxu1 %vm577_vm1, %v1389_v19  ;;  %v1631_v19 = vld [vmem:[%s2835_s3 + $0x38] sm:$0xff] }
 0x6cf   : > { %v943_v26 = vpop.xlane.xlu1 %942 }
 0x6d0   : > { %v947_v37 = vsub.f32 %v939_v58, %v943_v26  ;;  %v1634_v26 = vld [vmem:[%s2835_s3 + $0x50] sm:$0xff] }
 0x6d2   : > { %v949_v44 = vmul.f32 1.442695, %v947_v37 }
 0x701   : > { %v946_v25 = vpop.xlane.xlu0 %945 }
 0x702   : > { %v948_v10 = vsub.f32 %v940_v62, %v946_v25 }
 0x704   : > { %v951_v27 = vmul.f32 1.442695, %v948_v10  ;;  %v1635_v10 = vld [vmem:[%s2835_s3 + $0x58] sm:$0xff] }
 0x705   : > { %v2140_v37 = vpack.c.bf16 %v1635_v10, %v1634_v26 }
 0x706   : > { %2233 = vpow2.f32 %v951_v27  ;;  %v1636_v27 = vld [vmem:[%s2835_s3 + $0x60] sm:$0xff] }
 0x707   : > { %2235 = vpow2.f32 %v949_v44  ;;  %v1637_v44 = vld [vmem:[%s2835_s3 + $0x68] sm:$0xff] }
 0x710   : > { %v2234_v45 = vpop.eup %2233 }
 0x711   : > { %v2236_v42 = vpop.eup %2235  ;;  %v956_v13 = vsel %vm542_vm0, %v2234_v45, 0.0 }
 0x712   : > { %v953_v43 = vsel %vm542_vm0, %v2236_v42, 0.0 }
 0x77c   : > { %v1966_v20 = vpop.f32.mrb[10].mxu1 }
 0x77d   : > { %v1313_v21 = vpop.f32.mrb[11].mxu1 }
 0x77e   : > { %v2203_v22 = vpack.i.bf16 %v1966_v20, %v1313_v21  ;;  %v2132_v20 = vpack.c.bf16 %v1631_v19, %v1630_v18  ;;  %v1632_v21 = vld [vmem:[%s2835_s3 + $0x40] sm:$0xff] }
 0x79b   : > { %v1973_v24 = vpop.f32.mrb[12].mxu1 }
 0x79c   : > { %v1480_v33 = vmul.f32 0.17677669, %v1973_v24  ;;  %v1470_v57 = vpop.f32.mrb[13].mxu1  ;;  %v2144_v24 = vpack.c.bf16 %v1637_v44, %v1636_v27 }
 0x79d   : > { %v1479_v34 = vmul.f32 0.17677669, %v1470_v57  ;;  %v1639_v57 = vld [vmem:[%s2835_s3 + $0x78] sm:$0xff] }
 0x79e   : > { %v1482_v38 = vadd.f32 %v2602_v5, %v1480_v33  ;;  %v1638_v33 = vld [vmem:[%s2835_s3 + $0x70] sm:$0xff] }
 0x79f   : > { %v1481_v39 = vadd.f32 %v2602_v5, %v1479_v34  ;;  %v2148_v34 = vpack.c.bf16 %v1639_v57, %v1638_v33 }
 0x7a0   : > { %v1486_v40 = vsel %vm542_vm0, %v1482_v38, -inf }
 0x7a1   : > { %1487 = vmax.xlane.f32.xlu1 %v1486_v40  ;;  %v1483_v41 = vsel %vm542_vm0, %v1481_v39, -inf }
 0x7a2   : > { %1484 = vmax.xlane.f32.xlu0 %v1483_v41 }
 0x7a5   : > { %957 = vadd.xlane.f32.xlu1 %v956_v13 }
 0x7a6   : > { %954 = vadd.xlane.f32.xlu0 %v953_v43 }
 0x82e   : > { %v1488_v47 = vpop.xlane.xlu1 %1487 }
 0x82f   : > { %v1490_v48 = vsub.f32 %v1482_v38, %v1488_v47  ;;  %v1485_v32 = vpop.xlane.xlu0 %1484 }
 0x830   : > { %v1489_v49 = vsub.f32 %v1481_v39, %v1485_v32 }
 0x831   : > { %v1493_v50 = vmul.f32 1.442695, %v1490_v48 }
 0x832   : > { %v1491_v5 = vmul.f32 1.442695, %v1489_v49  ;;  %v958_v54 = vpop.xlane.xlu1 %957 }
 0x833   : > { %2237 = vpow2.f32 %v1493_v50  ;;  %v955_v51 = vpop.xlane.xlu0 %954 }
 0x834   : > { %2239 = vpow2.f32 %v1491_v5 }
 0x835   : > { %2241 = vrcp.f32 %v955_v51 }
 0x836   : > { %2243 = vrcp.f32 %v958_v54 }
 0x83d   : > { %v2238_v46 = vpop.eup %2237 }
 0x83e   : > { %v2240_v52 = vpop.eup %2239  ;;  %v1498_v23 = vsel %vm542_vm0, %v2238_v46, 0.0 }
 0x83f   : > { %1499 = vadd.xlane.f32.xlu1 %v1498_v23  ;;  %v1495_v53 = vsel %vm542_vm0, %v2240_v52, 0.0  ;;  %v2242_v31 = vpop.eup %2241 }
 0x840   : > { %1496 = vadd.xlane.f32.xlu0 %v1495_v53  ;;  %v960_v29 = vmul.f32 %v2242_v31, %v2236_v42  ;;  %v2244_v28 = vpop.eup %2243 }
 0x841   : > { %v962_v0 = vmul.f32 %v2244_v28, %v2234_v45 }
 0x842   : > { %1950 = vmatprep.mubr.msk.f32.mxu0 %vm542_vm0, %v960_v29 }
 0x850   : > { %2194 = vrot.lane.b32.xlu1 %v2504_v35, %s2264_s23 }
 0x856   : > { %2189 = vrot.lane.b32.xlu0 %v2504_v35, %s2266_s27 }
 0x85a   : > { %2204 = vrot.lane.b32.xlu0 %v2203_v22, %s2265_s26  ;;  %v1633_v22 = vld [vmem:[%s2835_s3 + $0x48] sm:$0xff] }
 0x85b   : > { %v2136_v25 = vpack.c.bf16 %v1633_v22, %v1632_v21 }
 0x8cc   : > { %v1500_v55 = vpop.xlane.xlu1 %1499 }
 0x8cd   : > { %v1497_v36 = vpop.xlane.xlu0 %1496 }
 0x8ce   : > { %2245 = vrcp.f32 %v1497_v36  ;;  %v2250_v36 = vld [vmem:[%s2365_s13] sm:$0xff] }
 0x8cf   : > { %2247 = vrcp.f32 %v1500_v55 }
 0x8d0   : > { %v2195_v56 = vpop.permute.xlu1 %2194 }
 0x8d1   : > { %v2190_v58 = vpop.permute.xlu0 %2189  ;;  %v2197_v59 = vunpack.i.h.bf16 %v2195_v56  ;;  %v2196_v60 = vunpack.i.l.bf16 %v2195_v56 }
 0x8d2   : > { %v2192_v30 = vunpack.i.h.bf16 %v2190_v58  ;;  %v2191_v61 = vunpack.i.l.bf16 %v2190_v58 }
 0x8d3   : > { %v2116_v63 = vpack.c.bf16 %v2197_v59, %v2196_v60 }
 0x8d4   : > { %v2096_v62 = vpack.c.bf16 %v2192_v30, %v2191_v61 }
 0x8d5   : > { %v2205_v43 = vpop.permute.xlu0 %2204 }
 0x8d6   : > { %2097 = vmatprep.subr.bf16.mxu0 %v2096_v62  ;;  %v2207_v50 = vunpack.i.h.bf16 %v2205_v43  ;;  %v2206_v5 = vunpack.i.l.bf16 %v2205_v43 }
 0x8d7   : > { %2099 = vmatpush3.bf16.msra.mxu0 %v2096_v62 }
 0x8d8   : > { %v2246_v35 = vpop.eup %2245  ;;  %2117 = vmatprep.subr.bf16.mxu0 %v2116_v63 }
 0x8d9   : > { %v2248_v6 = vpop.eup %2247  ;;  %v1502_v4 = vmul.f32 %v2246_v35, %v2240_v52 }
 0x8da   : > { %1951 = vmatmul.mubr.msk.f32.vlgmr.msra.gmra.mrb[4].mxu0 %vm542_vm0, %v962_v0  ;;  %v1504_v7 = vmul.f32 %v2248_v6, %v2238_v46 }
 0x8db   : > { %2119 = vmatpush3.bf16.msra.mxu0 %v2116_v63  ;;  %1978 = vmatprep.mubr.msk.f32.mxu0 %vm542_vm0, %v1502_v4 }
 0x8dc   : > { %2121 = vmatprep.subr.bf16.mxu0 %v2120_v12 }
 0x8de   : > { %1979 = vmatmul.mubr.msk.f32.vlgmr.msra.gmra.mrb[6].mxu0 %vm542_vm0, %v1504_v7 }
 0x8df   : > { %2123 = vmatpush3.bf16.msra.mxu0 %v2120_v12 }
 0x8e0   : > { %2125 = vmatprep.subr.bf16.mxu0 %v2124_v14 }
 0x8e3   : > { %2127 = vmatpush3.bf16.msra.mxu0 %v2124_v14 }
 0x8e4   : > { %2129 = vmatprep.subr.bf16.mxu0 %v2128_v17 }
 0x8e7   : > { %2131 = vmatpush3.bf16.msra.mxu0 %v2128_v17 }
 0x8e8   : > { %2133 = vmatprep.subr.bf16.mxu0 %v2132_v20 }
 0x8eb   : > { %2135 = vmatpush3.bf16.msra.mxu0 %v2132_v20 }
 0x8ec   : > { %2137 = vmatprep.subr.bf16.mxu0 %v2136_v25 }
 0x8ef   : > { %2139 = vmatpush3.bf16.msra.mxu0 %v2136_v25 }
 0x8f0   : > { %2141 = vmatprep.subr.bf16.mxu0 %v2140_v37 }
 0x8f3   : > { %2143 = vmatpush3.bf16.msra.mxu0 %v2140_v37 }
 0x8f4   : > { %2145 = vmatprep.subr.bf16.mxu0 %v2144_v24 }
 0x8f7   : > { %2147 = vmatpush3.bf16.msra.mxu0 %v2144_v24 }
 0x8f8   : > { %2149 = vmatprep.subr.bf16.mxu0 %v2148_v34 }
 0x8fb   : > { %2151 = vmatpush3.bf16.msra.mxu0 %v2148_v34 }
 0x9ad   : > { %v1952_v38 = vpop.f32.mrb[4].mxu0 }
 0x9ae   : > { %v1043_v39 = vpop.f32.mrb[5].mxu0 }
 0x9af   : > { %v2198_v40 = vpack.i.bf16 %v1952_v38, %v1043_v39 }
 0x9b1   : > { %2199 = vrot.lane.b32.xlu1 %v2198_v40, %s2264_s23  ;;  %v1980_v45 = vpop.f32.mrb[6].mxu0 }
 0x9b2   : > { %v1583_v41 = vpop.f32.mrb[7].mxu0 }
 0x9b3   : > { %v2208_v42 = vpack.i.bf16 %v1980_v45, %v1583_v41 }
 0x9b5   : > { %2209 = vrot.lane.b32.xlu1 %v2208_v42, %s2266_s27 }
 0xa23   : > { %v2200_v13 = vpop.permute.xlu1 %2199 }
 0xa24   : > { %v2202_v47 = vunpack.i.h.bf16 %v2200_v13  ;;  %v2201_v48 = vunpack.i.l.bf16 %v2200_v13 }
 0xa26   : > { %v1617_v32 = vsel %vm577_vm1, %v2694_v1, %v2202_v47  ;;  %v1616_v49 = vsel %vm577_vm1, %v2696_v2, %v2201_v48  ;;  %v2249_v2 = vld [vmem:[%s2365_s13 + $0x8] sm:$0xff] }
 0xa27   : > { %v2210_v51 = vpop.permute.xlu1 %2209  ;;  %v1619_v23 = vsel %vm1618_vm3, %v1616_v49, %v2206_v5  ;;  %v1620_v53 = vsel %vm1618_vm3, %v1617_v32, %v2207_v50 }
 0xa28   : > { %v2212_v46 = vunpack.i.h.bf16 %v2210_v51  ;;  %v2211_v52 = vunpack.i.l.bf16 %v2210_v51 }
 0xa2a   : > { %v1622_v31 = vsel %vm1621_vm4, %v1619_v23, %v2211_v52  ;;  %v1623_v29 = vsel %vm1621_vm4, %v1620_v53, %v2212_v46 }
 0xa2b   : > { %2013 = vmatprep.mubr.f32.mxu0 %v1622_v31 }
 0xa2c   : > { %2014 = vmatmul.mubr.f32.vlgmr.msra.gmra.mrb[8].mxu0 %v1623_v29 }
 0xaff   : > { %v2015_v1 = vpop.f32.mrb[8].mxu0 }
 0xb00   : > { %v1716_v54 = vadd.f32 %v2249_v2, %v2015_v1  ;;  %v1706_v55 = vpop.f32.mrb[9].mxu0 }
 0xb01   : > { %v1715_v56 = vadd.f32 %v2250_v36, %v1706_v55 }
 0xb02   : > { %1718 = vst [vmem:[%s292_s22 + $0x8] sm:$0xff] %v1716_v54 }
 0xb03   : > { %1717 = vst [vmem:[%s292_s22] sm:$0xff] %v1715_v56 }
 0xb04 PF: > { %s17_s24 = sadd.s32 1, %s2257_s24  }
 0xb05   : > { %p14_p4 = scmp.ge.s32.totalorder %s17_s24, 4  }
 0xb07   :  { %16 = sbr.rel (!%p14_p4) target bundleno = 1 (0x1), region = 81 }

// kernel: _lambda_.9
= control target key start
LH: loop header
LB: loop body
LE: loop exit
PB: predicated region body
PF: predicated region fallthrough
CT: control target
= control target key end

     0   :  { %12 = vsyncpa [#allocation3], 0  ;;  %s1614_s0 = inlined_call_operand.vmem [shape: f32[2,16,128], index: 0, kind: input, shape index: {}]   ;;  %s1615_s1 = inlined_call_operand.vmem [shape: f32[1,128], index: 1, kind: input, shape index: {}]   ;;  %s1616_s2 = inlined_call_operand.vmem [shape: f32[1,128], index: 2, kind: input, shape index: {}]   ;;  %s1617_s3 = inlined_call_operand.vmem [shape: f32[128,384], index: 3, kind: input, shape index: {}]   ;;  %s1618_s4 = inlined_call_operand.vmem [shape: f32[16,16], index: 4, kind: input, shape index: {}]   ;;  %s1619_s5 = inlined_call_operand.vmem [shape: f32[2,1,16], index: 5, kind: input, shape index: {}]   ;;  %s1620_s6 = inlined_call_operand.vmem [shape: f32[1,128], index: 6, kind: input, shape index: {}]   ;;  %s1621_s7 = inlined_call_operand.hbm [shape: f32[2,1,128], index: 7, kind: output, shape index: {}]  }
   0x1   :  { %14 = vsyncpa [#allocation3 + $0x1], 0  ;;  %s1325_s24 = smov 0   ;;  %s1327_s25 = smov 0  }
   0x2   :  { %s1329_s26 = smov 0   ;;  %s1331_s27 = smov 0  }
   0x3 LB: > { %s1346_s28 = sadd.s32 4294967295, %s1278_s27   ;;  %s965_s29 = sadd.s32 4294967294, %s1278_s27   ;;  %s1278_s27 = sphi %s1331_s27, %s1627_s27   ;;  %s1274_s26 = sphi %s1329_s26, %s1626_s26   ;;  %s1270_s25 = sphi %s1327_s25, %s1625_s25   ;;  %s1266_s24 = sphi %s1325_s24, %s1624_s24  }
   0x4   : > { %s1350_s30 = sadd.s32 1, %s1278_s27   ;;  %s184_s8 = sadd.s32 1, %s1274_s26 }
   0x5   : > { %s181_s9 = ssub.s32 %s1278_s27, %s1350_s30  ;;  %p194_p0 = scmp.ne.s32.totalorder %s1274_s26, %s1270_s25 }
   0x6   : > { %p182_p1 = scmp.eq.s32.totalorder %s181_s9, 0  ;;  %p195_p2 = scmp.eq.s32.totalorder %s1346_s28, 1 }
   0x7   : > { %p200_p3 = scmp.ne.s32.totalorder %s1270_s25, %s1266_s24  ;;  %p201_p4 = scmp.eq.s32.totalorder %s965_s29, 1 }
   0x8   : > { %s1361_s10 = scalar_select %p182_p1, %s1274_s26, %s184_s8  }
   0x9   : > { %p1363_p5 = por %p195_p2, %p194_p0  ;;  %p1367_p6 = por %p201_p4, %p200_p3 }
   0xa   : > { %p968_p7 = scmp.ge.s32.totalorder %s1278_s27, 1  ;;  %p248_p8 = scmp.lt.s32.totalorder %s1278_s27, 3 }
   0xc   : > { %p249_p9 = pnand %p968_p7, %p248_p8 }
   0xd   : > { %p282_p10 = scmp.lt.s32.totalorder (!%p249_p9), %s1346_s28, 1  ;;  %v340_v4 = vld [vmem:[%s1617_s3 + $0x8] sm:$0xff] (!%p249_p9)  ;;  %v343_v5 = vld [vmem:[%s1617_s3 + $0x20] sm:$0xff] (!%p249_p9)  ;;  %v342_v8 = vld [vmem:[%s1617_s3 + $0x18] sm:$0xff] (!%p249_p9)  ;;  %vm626_vm2 = vcmask (!%p249_p9), 130048   ;;  %vm1283_vm3 = vmmov (!%p249_p9), 0  }
   0xe   : > { %252 = sbr.rel (%p249_p9) target bundleno = 2085 (0x825), region = 48  ;;  %v339_v6 = vld [vmem:[%s1617_s3] sm:$0xff] (!%p249_p9)  ;;  %v1075_v7 = vpack.c.bf16 (!%p249_p9), %v343_v5, %v340_v4  ;;  %v346_v9 = vld [vmem:[%s1617_s3 + $0x38] sm:$0xff] (!%p249_p9)  ;;  %v349_v10 = vld [vmem:[%s1617_s3 + $0x50] sm:$0xff] (!%p249_p9)  ;;  %vm802_vm4 = vcmask (!%p249_p9), 122880   ;;  %s280_s22 = sand.u32 (!%p249_p9), 1, %s1270_s25  }
   0xf   : > { %v1077_v11 = vpack.c.bf16 (!%p249_p9), %v342_v8, %v339_v6  ;;  %v1079_v12 = vpack.c.bf16 (!%p249_p9), %v349_v10, %v346_v9  ;;  %v341_v13 = vld [vmem:[%s1617_s3 + $0x10] sm:$0xff] (!%p249_p9)  ;;  %v344_v14 = vld [vmem:[%s1617_s3 + $0x28] sm:$0xff] (!%p249_p9)  ;;  %v355_v19 = vld [vmem:[%s1617_s3 + $0x80] sm:$0xff] (!%p249_p9)  ;;  %s281_s23 = scalar_lea.vmem (!%p249_p9), [#allocation2], %s280_s22  ;;  %s976_s8 = sshll.u32 (!%p249_p9), %s1346_s28, 4 }
  0x10   : > { %v345_v15 = vld [vmem:[%s1617_s3 + $0x30] sm:$0xff] (!%p249_p9)  ;;  %1076 = vmatprep.subr.bf16.mxu0 (!%p249_p9), %v1075_v7  ;;  %v1107_v16 = vpack.c.bf16 (!%p249_p9), %v344_v14, %v341_v13  ;;  %v348_v17 = vld [vmem:[%s1617_s3 + $0x48] sm:$0xff] (!%p249_p9)  ;;  %v347_v21 = vld [vmem:[%s1617_s3 + $0x40] sm:$0xff] (!%p249_p9)  ;;  %v1280_v13 = vmov (!%p249_p9), 0.0   ;;  %s901_s29 = sshll.u32 (!%p249_p9), %s281_s23, 4  ;;  %s1574_s15 = scalar_lea.hbm (!%p249_p9), %s1621_s7, %s976_s8  ;;  %s1569_s29 = int_to_ptr.vmem [resolvable:$true] %s901_s29 }
  0x11   : > { %v352_v18 = vld [vmem:[%s1617_s3 + $0x68] sm:$0xff] (!%p249_p9)  ;;  %1078 = vmatpush1.bf16.msra.mxu0 (!%p249_p9), %v1077_v11  ;;  %v1081_v20 = vpack.c.bf16 (!%p249_p9), %v348_v17, %v345_v15  ;;  %v350_v22 = vld [vmem:[%s1617_s3 + $0x58] sm:$0xff] (!%p249_p9)  ;;  %v351_v25 = vld [vmem:[%s1617_s3 + $0x60] sm:$0xff] (!%p249_p9)  ;;  %451 = vmatprep.mubr.f32.mxu0 (!%p249_p9), %v1280_v13 }
  0x12   : > { %1080 = vmatprep.subr.bf16.mxu0 (!%p249_p9), %v1079_v12  ;;  %1108 = vmatprep.subr.bf16.mxu1 (!%p249_p9), %v1107_v16  ;;  %v1083_v23 = vpack.c.bf16 (!%p249_p9), %v355_v19, %v352_v18  ;;  %v1111_v24 = vpack.c.bf16 (!%p249_p9), %v350_v22, %v347_v21  ;;  %v354_v26 = vld [vmem:[%s1617_s3 + $0x78] sm:$0xff] (!%p249_p9)  ;;  %v361_v28 = vld [vmem:[%s1617_s3 + $0xb0] sm:$0xff] (!%p249_p9)  ;;  %v356_v30 = vld [vmem:[%s1617_s3 + $0x88] sm:$0xff] (!%p249_p9) }
  0x13   : > { %v358_v27 = vld [vmem:[%s1617_s3 + $0x98] sm:$0xff] (!%p249_p9)  ;;  %1110 = vmatpush3.bf16.msra.mxu1 (!%p249_p9), %v1107_v16  ;;  %v353_v29 = vld [vmem:[%s1617_s3 + $0x70] sm:$0xff] (!%p249_p9)  ;;  %v1085_v32 = vpack.c.bf16 (!%p249_p9), %v354_v26, %v351_v25  ;;  %v971_v41 = vld [vmem:[%s1615_s1] ss:$0 sm:$0xff] (!%p249_p9) }
  0x14   : > { %1112 = vmatprep.subr.bf16.mxu1 (!%p249_p9), %v1111_v24  ;;  %v1115_v31 = vpack.c.bf16 (!%p249_p9), %v356_v30, %v353_v29  ;;  %v1087_v33 = vpack.c.bf16 (!%p249_p9), %v361_v28, %v358_v27  ;;  %v357_v49 = vld [vmem:[%s1617_s3 + $0x90] sm:$0xff] (!%p249_p9)  ;;  %v360_v50 = vld [vmem:[%s1617_s3 + $0xa8] sm:$0xff] (!%p249_p9)  ;;  %v367_v53 = vld [vmem:[%s1617_s3 + $0xe0] sm:$0xff] (!%p249_p9) }
  0x15   : > { %s1375_s13 = scalar_select %p282_p10, %s1346_s28, 1  ;;  %1082 = vmatpush1.bf16.msra.mxu0 %v1081_v20  ;;  %v1089_v51 = vpack.c.bf16 %v360_v50, %v357_v49  ;;  %v364_v52 = vld [vmem:[%s1617_s3 + $0xc8] sm:$0xff]  ;;  %v359_v54 = vld [vmem:[%s1617_s3 + $0xa0] sm:$0xff]  ;;  %v362_v56 = vld [vmem:[%s1617_s3 + $0xb8] sm:$0xff] }
  0x16   : > { %1084 = vmatprep.subr.bf16.mxu0 %v1083_v23  ;;  %v1091_v55 = vpack.c.bf16 %v367_v53, %v364_v52  ;;  %v363_v57 = vld [vmem:[%s1617_s3 + $0xc0] sm:$0xff]  ;;  %v366_v58 = vld [vmem:[%s1617_s3 + $0xd8] sm:$0xff]  ;;  %v1119_v59 = vpack.c.bf16 %v362_v56, %v359_v54  ;;  %v373_v62 = vld [vmem:[%s1617_s3 + $0x110] sm:$0xff]  ;;  %v1281_v53 = vmov 0   ;;  %s1284_s28 = smov [#allocation2]  }
  0x17   : > { %s979_s14 = sshll.u32 %s1375_s13, 4  ;;  %1114 = vmatpush3.bf16.msra.mxu1 %v1111_v24  ;;  %v1093_v60 = vpack.c.bf16 %v366_v58, %v363_v57  ;;  %v370_v61 = vld [vmem:[%s1617_s3 + $0xf8] sm:$0xff]  ;;  %v365_v63 = vld [vmem:[%s1617_s3 + $0xd0] sm:$0xff]  ;;  %v376_v6 = vld [vmem:[%s1617_s3 + $0x128] sm:$0xff]  ;;  %s289_s16 = scalar_lea.vmem %s1619_s5, %s1375_s13 }
  0x18   : > { %s286_s17 = scalar_lea.vmem %s1614_s0, %s979_s14  ;;  %1116 = vmatprep.subr.bf16.mxu1 %v1115_v31  ;;  %v379_v7 = vld [vmem:[%s1617_s3 + $0x140] sm:$0xff]  ;;  %v374_v10 = vld [vmem:[%s1617_s3 + $0x118] sm:$0xff]  ;;  %v385_v17 = vld [vmem:[%s1617_s3 + $0x170] sm:$0xff]  ;;  %s1220_s18 = sshll.u32 %s1284_s28, 4  ;;  %s1221_s18 = int_to_ptr.vmem [resolvable:$false] %s1220_s18 }
  0x19   : > { %v290_v0 = vld [vmem:[%s286_s17] sm:$0xff]  ;;  %v291_v1 = vld [vmem:[%s286_s17 + $0x8] sm:$0xff]  ;;  %1086 = vmatpush1.bf16.msra.mxu0 %v1085_v32  ;;  %v1099_v9 = vpack.c.bf16 %v379_v7, %v376_v6  ;;  %v378_v12 = vld [vmem:[%s1617_s3 + $0x138] sm:$0xff]  ;;  %s1216_s17 = scalar_lea.vmem %s1569_s29, 16  ;;  %s1222_s19 = scalar_lea.vmem %s1221_s18, 32 }
  0x1a   : > { %v293_v2 = vmul.f32 %v290_v0, %v290_v0  ;;  %v294_v3 = vmul.f32 %v291_v1, %v291_v1  ;;  %1088 = vmatprep.subr.bf16.mxu0 %v1087_v33  ;;  %v371_v8 = vld [vmem:[%s1617_s3 + $0x100] sm:$0xff]  ;;  %v382_v16 = vld [vmem:[%s1617_s3 + $0x158] sm:$0xff]  ;;  %v377_v18 = vld [vmem:[%s1617_s3 + $0x130] sm:$0xff]  ;;  %p1217_p11 = scmp.ne.s32.totalorder %s1569_s29, %s1216_s17  ;;  %p1223_p0 = scmp.lt.s32.totalorder %s1569_s29, %s1221_s18 }
  0x1b   : > { %1118 = vmatpush3.bf16.msra.mxu1 %v1115_v31  ;;  %v375_v11 = vld [vmem:[%s1617_s3 + $0x120] sm:$0xff]  ;;  %v1127_v14 = vpack.c.bf16 %v374_v10, %v371_v8  ;;  %v1103_v19 = vpack.c.bf16 %v385_v17, %v382_v16  ;;  %v380_v20 = vld [vmem:[%s1617_s3 + $0x148] sm:$0xff]  ;;  %v381_v21 = vld [vmem:[%s1617_s3 + $0x150] sm:$0xff]  ;;  %p1224_p1 = scmp.lt.s32.totalorder %s1222_s19, %s1216_s17 }
  0x1c   : > { %295 = vadd.xlane.f32.xlu0 %v293_v2  ;;  %1120 = vmatprep.subr.bf16.mxu1 %v1119_v59  ;;  %v369_v2 = vld [vmem:[%s1617_s3 + $0xf0] sm:$0xff]  ;;  %v1101_v15 = vpack.c.bf16 %v378_v12, %v375_v11  ;;  %v384_v22 = vld [vmem:[%s1617_s3 + $0x168] sm:$0xff]  ;;  %v1131_v23 = vpack.c.bf16 %v380_v20, %v377_v18  ;;  %v383_v25 = vld [vmem:[%s1617_s3 + $0x160] sm:$0xff]  ;;  %p1218_p12 = pnand %p1217_p11, %p1363_p5 }
  0x1d   : > { %1090 = vmatpush1.bf16.msra.mxu0 %v1089_v51  ;;  %v1105_v24 = vpack.c.bf16 %v384_v22, %v381_v21  ;;  %v386_v26 = vld [vmem:[%s1617_s3 + $0x178] sm:$0xff]  ;;  %v539_v50 = vld [vmem:[%s289_s16] sm:$0x1]  ;;  %v541_v56 = vld [vmem:[%s1618_s4 + $0x8] sm:$0xff]  ;;  %s889_s16 = scalar_lea.sflag [#allocation3], %s280_s22  ;;  %p1225_p2 = por %p1224_p1, %p1223_p0 }
  0x1e   : > { %1092 = vmatprep.subr.bf16.mxu0 %v1091_v55  ;;  %v1135_v27 = vpack.c.bf16 %v386_v26, %v383_v25  ;;  %vm617_vm0 = vcmp.gt.f32.partialorder %v539_v50, 0.5  ;;  %v540_v57 = vld [vmem:[%s1618_s4] sm:$0xff]  ;;  %p1219_p13 = pneg %p1218_p12 }
  0x1f   : > { %1122 = vmatpush3.bf16.msra.mxu1 %v1119_v59  ;;  %v618_v54 = vsel %vm617_vm0, 1, %v1281_v53 }
  0x20   : > { %297 = vadd.xlane.f32.xlu0 %v294_v3  ;;  %v372_v3 = vld [vmem:[%s1617_s3 + $0x108] sm:$0xff]  ;;  %p1226_p3 = pnand %p1225_p2, %p1219_p13 }
  0x21   : > { %1094 = vmatpush1.bf16.msra.mxu0 %v1093_v60  ;;  %v1097_v5 = vpack.c.bf16 %v372_v3, %v369_v2 }
  0xa9   : > { %v296_v34 = vpop.xlane.xlu0 %295 }
  0xaa   : > { %v300_v35 = vmul.f32 0.0078125, %v296_v34 }
  0xac   : > { %v302_v36 = vadd.f32 1e-05, %v300_v35  ;;  %v972_v35 = vld [vmem:[%s1616_s2] ss:$0 sm:$0xff] }
  0xad   : > { %v298_v37 = vpop.xlane.xlu0 %297 }
  0xae   : > { %1196 = vrsqrt.f32 %v302_v36  ;;  %v301_v38 = vmul.f32 0.0078125, %v298_v37 }
  0xb0   : > { %v303_v39 = vadd.f32 1e-05, %v301_v38 }
  0xb2   : > { %1198 = vrsqrt.f32 %v303_v39 }
  0xb8   : > { %v1197_v40 = vpop.eup %1196 }
  0xb9   : > { %v306_v42 = vmul.f32 %v1197_v40, %v290_v0  ;;  %v1095_v0 = vpack.c.bf16 %v373_v62, %v370_v61 }
  0xbb   : > { %v1444_v43 = vmul.f32 %v971_v41, %v306_v42  ;;  %1096 = vmatprep.subr.bf16.mxu0 %v1095_v0 }
  0xbc   : > { %v1199_v44 = vpop.eup %1198  ;;  %1098 = vmatpush1.bf16.msra.mxu0 %v1097_v5 }
  0xbd   : > { %v317_v45 = vmul.f32 %v1444_v43, %v1444_v43  ;;  %v307_v46 = vmul.f32 %v1199_v44, %v291_v1  ;;  %v368_v1 = vld [vmem:[%s1617_s3 + $0xe8] sm:$0xff]  ;;  %1100 = vmatprep.subr.bf16.mxu0 %v1099_v9 }
  0xbe   : > { %v1123_v4 = vpack.c.bf16 %v368_v1, %v365_v63 }
  0xbf   : > { %319 = vadd.xlane.f32.xlu1 %v317_v45  ;;  %v1448_v47 = vmul.f32 %v971_v41, %v307_v46 }
  0xc0   : > { %1124 = vmatprep.subr.bf16.mxu1 %v1123_v4  ;;  %1102 = vmatpush1.bf16.msra.mxu0 %v1101_v15 }
  0xc1   : > { %v318_v48 = vmul.f32 %v1448_v47, %v1448_v47  ;;  %1126 = vmatpush3.bf16.msra.mxu1 %v1123_v4  ;;  %1104 = vmatprep.subr.bf16.mxu0 %v1103_v19  ;;  %v1282_v19 = vmov 0.0|0.0  }
  0xc2   : > { %1128 = vmatprep.subr.bf16.mxu1 %v1127_v14 }
  0xc3   : > { %321 = vadd.xlane.f32.xlu1 %v318_v48 }
  0xc4   : > { %1106 = vmatpush1.bf16.msra.mxu0 %v1105_v24 }
  0xc5   : > { %1130 = vmatpush3.bf16.msra.mxu1 %v1127_v14 }
  0xc6   : > { %1132 = vmatprep.subr.bf16.mxu1 %v1131_v23 }
  0xc9   : > { %1134 = vmatpush3.bf16.msra.mxu1 %v1131_v23  ;;  %v730_v23 = vld [vmem:[%s1620_s6] sm:$0x1] }
  0xca   : > { %1136 = vmatprep.subr.bf16.mxu1 %v1135_v27 }
  0xcd   : > { %1138 = vmatpush3.bf16.msra.mxu1 %v1135_v27 }
 0x14c   : > { %v320_v28 = vpop.xlane.xlu1 %319 }
 0x14d   : > { %v323_v29 = vmul.f32 0.0078125, %v320_v28 }
 0x14f   : > { %v325_v30 = vadd.f32 1e-05, %v323_v29 }
 0x150   : > { %v322_v31 = vpop.xlane.xlu1 %321 }
 0x151   : > { %1200 = vrsqrt.f32 %v325_v30  ;;  %v324_v32 = vmul.f32 0.0078125, %v322_v31 }
 0x153   : > { %v326_v33 = vadd.f32 1e-05, %v324_v32 }
 0x155   : > { %1202 = vrsqrt.f32 %v326_v33 }
 0x15b   : > { %v1201_v34 = vpop.eup %1200 }
 0x15c   : > { %v329_v36 = vmul.f32 %v1201_v34, %v1444_v43 }
 0x15e   : > { %v337_v37 = vmul.f32 %v972_v35, %v329_v36 }
 0x15f   : > { %v1203_v38 = vpop.eup %1202 }
 0x160   : > { %452 = vmatmul.mubr.f32.vlgmr.msra.gmra.mrb[0].mxu0 %v337_v37  ;;  %1044 = vmatprep.mubr.f32.mxu1 %v337_v37  ;;  %v330_v39 = vmul.f32 %v1203_v38, %v1448_v47  ;;  %v619_v47 = vlaneseq }
 0x161   : > { %457 = vmatprep.mubr.f32.mxu0 %v1280_v13 }
 0x162   : > { %v338_v40 = vmul.f32 %v972_v35, %v330_v39  ;;  %v620_v51 = vshrl.u32 %v619_v47, 7 }
 0x164   : > { %458 = vmatmul.mubr.f32.gmra.mrb[2].mxu0 %v338_v40  ;;  %1045 = vmatmul.mubr.f32.vlgmr.msra.gmra.mrb[0].mxu1 %v338_v40  ;;  %v621_v52 = vsub.s32 0, %v620_v51 }
 0x166   : > { %v622_v55 = vrot.slane %v618_v54, %v621_v52 }
 0x168   : > { %vm623_vm1 = vcmp.eq.s32.totalorder %v622_v55, 1 }
 0x233   : > { %v453_v41 = vpop.f32.mrb[0].mxu0 }
 0x234   : > { %v455_v42 = vpop.f32.mrb[1].mxu0  ;;  %1051 = vmatprep.mubr.f32.mxu0 %v453_v41 }
 0x237   : > { %v459_v44 = vpop.f32.mrb[2].mxu0  ;;  %v1046_v45 = vpop.f32.mrb[0].mxu1 }
 0x238   : > { %v461_v46 = vpop.f32.mrb[3].mxu0  ;;  %v530_v48 = vpop.f32.mrb[1].mxu1 }
 0x239   : > { %v1139_v43 = vpack.c.bf16 %v461_v46, %v455_v42  ;;  %v1143_v49 = vpack.c.bf16 %v1046_v45, %v530_v48 }
 0x23b   : > { %1140 = vmatprep.subr.bf16.mxu0 %v1139_v43  ;;  %1144 = vmatprep.subr.bf16.mxu1 %v1143_v49 }
 0x23c   : > { %1142 = vmatpush3.bf16.xpose.msra.mxu0 %v1139_v43  ;;  %1146 = vmatpush3.bf16.msra.mxu1 %v1143_v49 }
 0x23d   : > { %1147 = vmatprep.subr.bf16.mxu1 %v1282_v19  ;;  %1150 = vmatprep.subr.bf16.mxu0 %v1282_v19 }
 0x243   : > { %1052 = vmatmul.mubr.f32.vlgmr.msra.gmra.mrb[4].mxu0 %v459_v44 }
 0x244   : > { %1072 = vmatprep.mubr.msk.f32.mxu0 %vm1283_vm3, %v1280_v13 }
 0x316   : > { %v1053_v58 = vpop.f32.mrb[4].mxu0 }
 0x317   : > { %v614_v59 = vadd.f32 %v1053_v58, %v541_v56  ;;  %v608_v60 = vpop.f32.mrb[5].mxu0 }
 0x318   : > { %v609_v61 = vadd.f32 %v608_v60, %v540_v57 }
 0x319   : > { %v625_v62 = vsel %vm623_vm1, %v614_v59, -1e+09 }
 0x31a   : > { %v630_v63 = vsel %vm626_vm2, %v625_v62, -inf  ;;  %v624_v0 = vsel %vm623_vm1, %v609_v61, -1e+09 }
 0x31b   : > { %631 = vmax.xlane.f32.xlu1 %v630_v63  ;;  %v627_v1 = vsel %vm626_vm2, %v624_v0, -inf }
 0x31c   : > { %628 = vmax.xlane.f32.xlu0 %v627_v1 }
 0x3a8   : > { %v632_v2 = vpop.xlane.xlu1 %631 }
 0x3a9   : > { %v634_v3 = vsub.f32 %v625_v62, %v632_v2  ;;  %v629_v4 = vpop.xlane.xlu0 %628 }
 0x3aa   : > { %v633_v5 = vsub.f32 %v624_v0, %v629_v4 }
 0x3ab   : > { %v637_v6 = vmul.f32 1.442695, %v634_v3 }
 0x3ac   : > { %v635_v7 = vmul.f32 1.442695, %v633_v5 }
 0x3ad   : > { %1204 = vpow2.f32 %v637_v6 }
 0x3ae   : > { %1206 = vpow2.f32 %v635_v7 }
 0x3b7   : > { %v1205_v8 = vpop.eup %1204 }
 0x3b8   : > { %v1207_v9 = vpop.eup %1206  ;;  %v642_v10 = vsel %vm626_vm2, %v1205_v8, 0.0 }
 0x3b9   : > { %643 = vadd.xlane.f32.xlu1 %v642_v10  ;;  %v639_v11 = vsel %vm626_vm2, %v1207_v9, 0.0 }
 0x3ba   : > { %640 = vadd.xlane.f32.xlu0 %v639_v11 }
 0x446   : > { %v644_v12 = vpop.xlane.xlu1 %643 }
 0x447   : > { %1208 = vrcp.f32 %v644_v12  ;;  %v641_v14 = vpop.xlane.xlu0 %640 }
 0x448   : > { %1210 = vrcp.f32 %v641_v14 }
 0x451   : > { %v1209_v15 = vpop.eup %1208 }
 0x452   : > { %v1211_v16 = vpop.eup %1210  ;;  %v648_v18 = vmul.f32 %v1209_v15, %v1205_v8 }
 0x453   : > { %v646_v17 = vmul.f32 %v1211_v16, %v1207_v9 }
 0x455   : > { %1058 = vmatprep.mubr.msk.f32.mxu1 %vm626_vm2, %v646_v17 }
 0x456   : > { %1059 = vmatmul.mubr.msk.f32.vlgmr.msra.gmra.mrb[2].mxu1 %vm626_vm2, %v648_v18 }
 0x457   : > { %1065 = vmatprep.mubr.msk.f32.mxu1 %vm1283_vm3, %v1280_v13 }
 0x529   : > { %v1060_v20 = vpop.f32.mrb[2].mxu1 }
 0x52a   : > { %v721_v21 = vpop.f32.mrb[3].mxu1 }
 0x52b   : > { %v1148_v22 = vpack.c.bf16 %v1060_v20, %v721_v21 }
 0x52d   : > { %1149 = vmatpush3.bf16.xpose.msra.mxu1 %v1148_v22  ;;  %1152 = vmatpush3.bf16.msra.mxu0 %v1148_v22 }
 0x534   : > { %1066 = vmatmul.mubr.f32.vlgmr.msra.gmra.mrb[4].mxu1 %v730_v23 }
 0x607   : > { %v797_v24 = vpop.f32.mrb[4].mxu1 }
 0x608   : > { %v801_v25 = vsel %vm617_vm0, %v797_v24, -1e+09  ;;  %v1067_v26 = vpop.f32.mrb[5].mxu1 }
 0x609   : > { %v803_v27 = vsel %vm802_vm4, %v801_v25, -inf }
 0x60a   : > { %804 = vmax.xlane.f32.xlu0 %v803_v27 }
 0x697   : > { %v805_v13 = vpop.xlane.xlu0 %804 }
 0x698   : > { %v806_v28 = vsub.f32 %v801_v25, %v805_v13 }
 0x69a   : > { %v807_v29 = vmul.f32 1.442695, %v806_v28 }
 0x69c   : > { %1212 = vpow2.f32 %v807_v29 }
 0x6a6   : > { %v1213_v30 = vpop.eup %1212 }
 0x6a7   : > { %v809_v31 = vsel %vm802_vm4, %v1213_v30, 0.0 }
 0x6a8   : > { %810 = vadd.xlane.f32.xlu1 %v809_v31 }
 0x735   : > { %v811_v32 = vpop.xlane.xlu1 %810 }
 0x736   : > { %1214 = vrcp.f32 %v811_v32 }
 0x740   : > { %v1215_v33 = vpop.eup %1214 }
 0x741   : > { %v813_v34 = vmul.f32 %v1215_v33, %v1213_v30 }
 0x743   : > { %1073 = vmatmul.mubr.msk.f32.vlgmr.msra.gmra.mrb[6].mxu0 %vm626_vm2, %v813_v34 }
 0x816   : > { %v883_v35 = vpop.f32.mrb[6].mxu0 }
 0x817   : > { %887 = vst [vmem:[%s281_s23] sm:$0x1] %v883_v35  ;;  %v1074_v36 = vpop.f32.mrb[7].mxu0 }
 0x818   : > { %1229 = shalt.err (!%p1226_p3)
}
 0x819   : > { %s1230_s20 = scalar_lea.hbm %s1574_s15, 16  ;;  %s1234_s22 = scalar_lea.hbm %s1621_s7, 32 }
 0x81a   : > { %p1231_p4 = scmp.ne.s32.totalorder %s1574_s15, %s1230_s20  ;;  %p1235_p9 = scmp.lt.u32.totalorder %s1574_s15, %s1621_s7 }
 0x81b   : > { %p1236_p10 = scmp.lt.u32.totalorder %s1234_s22, %s1230_s20  ;;  %p1238_p12 = scmp.lt.u32.totalorder %s1230_s20, %s1574_s15 }
 0x81c   : > { %p1232_p7 = pnand %p1231_p4, %p1363_p5 }
 0x81d   : > { %p1237_p11 = por %p1236_p10, %p1235_p9 }
 0x81e   : > { %p1233_p8 = pneg %p1232_p7 }
 0x81f   : > { %p1239_p13 = por %p1238_p12, %p1237_p11 }
 0x821   : > { %p1240_p0 = pnand %p1239_p13, %p1233_p8 }
 0x823   : > { %1243 = shalt.err (!%p1240_p0)
}
 0x824   : > { %1153 = dma.vmem_to_hbm [thread:$0]  (%p1363_p5), %s1569_s29, 16, %s1574_s15, %s889_s16  }
 0x825 PF: > { %p1159_p1 = scmp.ge.s32.totalorder %s1278_s27, 2  ;;  %s913_s9 = sand.u32 1, %s1266_s24  }
 0x826   : > { %s914_s14 = scalar_lea.sflag [#allocation3], %s913_s9 }
 0x827   : > { %p1156_p2 = pnand %p1159_p1, %p1367_p6 }
 0x829   : > { %1261 = dma.done.wait (!%p1156_p2), %s914_s14, 16  }
 0x82a   : > { %1263 = vsyncadd (!%p1156_p2), %s914_s14, 4294967280  ;;  %p17_p3 = scmp.ge.s32.totalorder %s1350_s30, 4   ;;  %s1624_s24 = smov %s1270_s25 }
 0x82b   : > { %s1625_s25 = smov %s1274_s26  ;;  %s1626_s26 = smov %s1361_s10 }
 0x82c   : > { %s1627_s27 = smov %s1350_s30  ;;  %19 = sbr.rel (!%p17_p3) target bundleno = 3 (0x3), region = 86 }
 0x833   :  { %918 = vsyncpa [#allocation3], 1 }
 0x834   :  { %920 = vsyncpa [#allocation3 + $0x1], 1 }

</bundles_post_ra>
